<compile_context>
chip_gen: v6e
topology: v6e:2x2x1
jax: 0.10.0
libtpu: 0.0.40
codegen_flags: <defaults>
</compile_context>

<pallas_src>
import functools
import math

import jax
import jax.numpy as jnp
from jax.experimental import pallas as pl
from jax.experimental.pallas import tpu as pltpu


# ---------------------------------------------------------------------------
# Pallas kernel: one transformer encoder layer for one (batch, q-tile) block.
# ---------------------------------------------------------------------------
def _layernorm(x, gamma, beta, eps=1e-5):
    mean = jnp.mean(x, axis=-1, keepdims=True)
    var = jnp.mean((x - mean) ** 2, axis=-1, keepdims=True)
    return (x - mean) * jax.lax.rsqrt(var + eps) * gamma + beta


def encoder_layer_kernel(xf_ref, xq_ref, mask_ref,
                         wq_ref, bq_ref, wk_ref, bk_ref, wv_ref, bv_ref,
                         wo_ref, bo_ref, g1_ref, be1_ref,
                         w1_ref, b1_ref, w2_ref, b2_ref, g2_ref, be2_ref,
                         o_ref, *, heads):
    xf = xf_ref[0]                       # (S,  D) f32  — full sequence (keys / values)
    xq = xq_ref[0]                       # (TQ, D) f32  — query tile / residual stream
    mask = mask_ref[0]                   # (TQ, S) int32, 1 = attend, 0 = masked
    tq, d = xq.shape
    dh = d // heads
    scale = 1.0 / math.sqrt(dh)

    xf_b = xf.astype(jnp.bfloat16)
    xq_b = xq.astype(jnp.bfloat16)

    # QKV projections: bf16 MXU matmuls, f32 accumulation, f32 bias add.
    q = jnp.dot(xq_b, wq_ref[...], preferred_element_type=jnp.float32) + bq_ref[...]
    k = jnp.dot(xf_b, wk_ref[...], preferred_element_type=jnp.float32) + bk_ref[...]
    v = jnp.dot(xf_b, wv_ref[...], preferred_element_type=jnp.float32) + bv_ref[...]

    # Fold 1/sqrt(dh) into q (cheaper than scaling the (H,TQ,S) scores).
    q = q * jnp.float32(scale)

    # Split heads onto a leading batch axis.  dh is a multiple of 128, so each slice is
    # lane-aligned (free view); the stack is a leading-axis concat (no relayout).
    def split_heads(a):                  # (N, D) -> (heads, N, dh), bf16
        return jnp.stack(
            [a[:, h * dh:(h + 1) * dh] for h in range(heads)], axis=0
        ).astype(jnp.bfloat16)

    qh = split_heads(q)                  # (H, TQ, dh)
    kh = split_heads(k)                  # (H, S,  dh)
    vh = split_heads(v)                  # (H, S,  dh)

    # Additive mask bias, computed once (not per head), broadcast over the head axis.
    bias = jnp.where(mask == 0, jnp.float32(-1e9), jnp.float32(0.0))   # (TQ, S)

    # Head-batched attention scores (no explicit .T — contraction over dh directly).
    scores = jnp.einsum('hqd,hkd->hqk', qh, kh,
                        preferred_element_type=jnp.float32)            # (H, TQ, S)
    scores = scores + bias[None, :, :]

    # Softmax in f32; reciprocal goes to the EUP slot.
    m = jnp.max(scores, axis=-1, keepdims=True)
    p = jnp.exp(scores - m)
    denom = jnp.sum(p, axis=-1, keepdims=True)
    p = p * pl.reciprocal(denom, approx=True)

    outh = jnp.einsum('hqk,hkd->hqd', p.astype(jnp.bfloat16), vh,
                      preferred_element_type=jnp.float32)              # (H, TQ, dh)

    # Merge heads once (lane-aligned concat) and do a single (TQ,D)@(D,D) projection.
    concat = jnp.concatenate([outh[h] for h in range(heads)], axis=-1)  # (TQ, D)
    attn = jnp.dot(concat.astype(jnp.bfloat16), wo_ref[...],
                   preferred_element_type=jnp.float32) + bo_ref[...]

    # Sublayer 1: residual + LayerNorm (dropout = identity in eval), all f32.
    y = _layernorm(xq + attn, g1_ref[...], be1_ref[...])

    # Sublayer 2: position-wise feed-forward + residual + LayerNorm.
    h1 = jnp.dot(y.astype(jnp.bfloat16), w1_ref[...],
                 preferred_element_type=jnp.float32) + b1_ref[...]
    h1 = jnp.maximum(h1, 0.0)
    h2 = jnp.dot(h1.astype(jnp.bfloat16), w2_ref[...],
                 preferred_element_type=jnp.float32) + b2_ref[...]
    z = _layernorm(y + h2, g2_ref[...], be2_ref[...])

    o_ref[0] = z.astype(o_ref.dtype)


# ---------------------------------------------------------------------------
# Wrappers
# ---------------------------------------------------------------------------
_WEIGHT_ORDER = ('wq', 'bq', 'wk', 'bk', 'wv', 'bv', 'wo', 'bo',
                 'g1', 'be1', 'w1', 'b1', 'w2', 'b2', 'g2', 'be2')


def encoder_layer(x, mask, p, heads, q_tile=8):
    B, S, D = x.shape
    TQ = min(q_tile, S)
    assert S % TQ == 0 and TQ % 8 == 0 and D % 128 == 0 and D % heads == 0
    weights = [p[k] for k in _WEIGHT_ORDER]

    def const_spec(w):
        # Constant block index => weights DMA'd once and stay resident across grid steps.
        return pl.BlockSpec(w.shape, lambda b, qi, _n=w.ndim: (0,) * _n)

    in_specs = ([pl.BlockSpec((1, S, D), lambda b, qi: (b, 0, 0)),    # full seq (K/V)
                 pl.BlockSpec((1, TQ, D), lambda b, qi: (b, qi, 0)),  # query tile
                 pl.BlockSpec((1, TQ, S), lambda b, qi: (b, qi, 0))]  # mask rows
                + [const_spec(w) for w in weights])

    return pl.pallas_call(
        functools.partial(encoder_layer_kernel, heads=heads),
        out_shape=jax.ShapeDtypeStruct((B, S, D), x.dtype),
        grid=(B, S // TQ),
        in_specs=in_specs,
        out_specs=pl.BlockSpec((1, TQ, D), lambda b, qi: (b, qi, 0)),
        compiler_params=pltpu.CompilerParams(
            dimension_semantics=("parallel", "parallel")),
    )(x, x, mask, *weights)


def positional_encoding(seq_len, dim):
    pos = jnp.arange(seq_len, dtype=jnp.float32)[:, None]
    div = jnp.exp(jnp.arange(0, dim, 2, dtype=jnp.float32) * (-math.log(10000.0) / dim))
    pe = jnp.zeros((seq_len, dim), jnp.float32)
    pe = pe.at[:, 0::2].set(jnp.sin(pos * div))
    pe = pe.at[:, 1::2].set(jnp.cos(pos * div))
    return pe


def transformer_encoder(tokens, src_mask, params, heads):
    # Embedding lookup + positional encoding (glue, plain JAX).
    x = params['embed'][tokens]                       # (B, S, D) f32
    x = x + positional_encoding(tokens.shape[1], x.shape[-1])[None]
    for layer_params in params['layers']:
        x = encoder_layer(x, src_mask, layer_params, heads)
    return x


# ---------------------------------------------------------------------------
# Deterministic synthetic parameters (matmul weights stored bf16; bias/LN f32).
# ---------------------------------------------------------------------------
def init_params(key, layers, heads, vocab_size, model_dim, ffn_dim):
    n_extra = 4  # stands in for len(Vocab.extra): <pad>, <unk>, <s>, </s>
    keys = jax.random.split(key, 1 + layers)
    embed = jax.random.normal(keys[0], (vocab_size + n_extra, model_dim), jnp.float32) * 0.02

    layer_params = []
    for li in range(layers):
        k = jax.random.split(keys[1 + li], 6)
        s_d = 1.0 / math.sqrt(model_dim)
        s_f = 1.0 / math.sqrt(ffn_dim)

        def w(kk, shape, s):
            return (jax.random.normal(kk, shape, jnp.float32) * s).astype(jnp.bfloat16)

        p = dict(
            wq=w(k[0], (model_dim, model_dim), s_d),
            bq=jnp.zeros((1, model_dim), jnp.float32),
            wk=w(k[1], (model_dim, model_dim), s_d),
            bk=jnp.zeros((1, model_dim), jnp.float32),
            wv=w(k[2], (model_dim, model_dim), s_d),
            bv=jnp.zeros((1, model_dim), jnp.float32),
            wo=w(k[3], (model_dim, model_dim), s_d),
            bo=jnp.zeros((1, model_dim), jnp.float32),
            g1=jnp.ones((1, model_dim), jnp.float32),
            be1=jnp.zeros((1, model_dim), jnp.float32),
            w1=w(k[4], (model_dim, ffn_dim), s_d),
            b1=jnp.zeros((1, ffn_dim), jnp.float32),
            w2=w(k[5], (ffn_dim, model_dim), s_f),
            b2=jnp.zeros((1, model_dim), jnp.float32),
            g2=jnp.ones((1, model_dim), jnp.float32),
            be2=jnp.zeros((1, model_dim), jnp.float32),
        )
        layer_params.append(p)
    return {'embed': embed, 'layers': layer_params}


# ---------------------------------------------------------------------------
if __name__ == "__main__":
    # Lane-dense small config: D multiple of 128, head_dim = 128, S multiple of 8.
    B, S = 2, 16
    LAYERS, HEADS, VOCAB, MODEL_DIM, FFN_DIM = 2, 2, 50, 256, 512

    key = jax.random.PRNGKey(0)
    k_tok, k_par = jax.random.split(key)

    params = init_params(k_par, LAYERS, HEADS, VOCAB, MODEL_DIM, FFN_DIM)

    tokens = jax.random.randint(k_tok, (B, S), 0, VOCAB + 4, dtype=jnp.int32)
    # src_mask (B, S, S): batch 0 attends to all 16 positions, batch 1 only first 9.
    lens = jnp.array([16, 9], dtype=jnp.int32)
    src_mask = (jnp.arange(S)[None, None, :] < lens[:, None, None]).astype(jnp.int32)
    src_mask = jnp.broadcast_to(src_mask, (B, S, S))

    out = transformer_encoder(tokens, src_mask, params, HEADS)
    out = jax.block_until_ready(out)
    assert out.shape == (B, S, MODEL_DIM) and out.dtype == jnp.float32
    print("KERNEL_OK")
</pallas_src>

<mosaic_0001>
module attributes {stable_mosaic.version = 11 : i64} {
  func.func @encoder_layer_kernel(%arg0: i32, %arg1: i32, %arg2: memref<1x16x256xf32, #tpu.memory_space<vmem>>, %arg3: memref<1x8x256xf32, #tpu.memory_space<vmem>>, %arg4: memref<1x8x16xi32, #tpu.memory_space<vmem>>, %arg5: memref<256x256xbf16, #tpu.memory_space<vmem>>, %arg6: memref<1x256xf32, #tpu.memory_space<vmem>>, %arg7: memref<256x256xbf16, #tpu.memory_space<vmem>>, %arg8: memref<1x256xf32, #tpu.memory_space<vmem>>, %arg9: memref<256x256xbf16, #tpu.memory_space<vmem>>, %arg10: memref<1x256xf32, #tpu.memory_space<vmem>>, %arg11: memref<256x256xbf16, #tpu.memory_space<vmem>>, %arg12: memref<1x256xf32, #tpu.memory_space<vmem>>, %arg13: memref<1x256xf32, #tpu.memory_space<vmem>>, %arg14: memref<1x256xf32, #tpu.memory_space<vmem>>, %arg15: memref<256x512xbf16, #tpu.memory_space<vmem>>, %arg16: memref<1x512xf32, #tpu.memory_space<vmem>>, %arg17: memref<512x256xbf16, #tpu.memory_space<vmem>>, %arg18: memref<1x256xf32, #tpu.memory_space<vmem>>, %arg19: memref<1x256xf32, #tpu.memory_space<vmem>>, %arg20: memref<1x256xf32, #tpu.memory_space<vmem>>, %arg21: memref<1x8x256xf32, #tpu.memory_space<vmem>>) attributes {dimension_semantics = [#tpu.dimension_semantics<parallel>, #tpu.dimension_semantics<parallel>], iteration_bounds = array<i64: 2, 2>, scalar_prefetch = 0 : i64, scratch_operands = 0 : i64, tpu.core_type = #tpu.core_type<tc>, window_params = [{transform_indices = @transform_0, window_bounds = array<i64: 1, 16, 256>}, {transform_indices = @transform_1, window_bounds = array<i64: 1, 8, 256>}, {transform_indices = @transform_2, window_bounds = array<i64: 1, 8, 16>}, {pipeline_mode = #tpu.pipeline_mode<synchronous>, transform_indices = @transform_3, window_bounds = array<i64: 256, 256>}, {pipeline_mode = #tpu.pipeline_mode<synchronous>, transform_indices = @transform_4, window_bounds = array<i64: 1, 256>}, {pipeline_mode = #tpu.pipeline_mode<synchronous>, transform_indices = @transform_5, window_bounds = array<i64: 256, 256>}, {pipeline_mode = #tpu.pipeline_mode<synchronous>, transform_indices = @transform_6, window_bounds = array<i64: 1, 256>}, {pipeline_mode = #tpu.pipeline_mode<synchronous>, transform_indices = @transform_7, window_bounds = array<i64: 256, 256>}, {pipeline_mode = #tpu.pipeline_mode<synchronous>, transform_indices = @transform_8, window_bounds = array<i64: 1, 256>}, {pipeline_mode = #tpu.pipeline_mode<synchronous>, transform_indices = @transform_9, window_bounds = array<i64: 256, 256>}, {pipeline_mode = #tpu.pipeline_mode<synchronous>, transform_indices = @transform_10, window_bounds = array<i64: 1, 256>}, {pipeline_mode = #tpu.pipeline_mode<synchronous>, transform_indices = @transform_11, window_bounds = array<i64: 1, 256>}, {pipeline_mode = #tpu.pipeline_mode<synchronous>, transform_indices = @transform_12, window_bounds = array<i64: 1, 256>}, {pipeline_mode = #tpu.pipeline_mode<synchronous>, transform_indices = @transform_13, window_bounds = array<i64: 256, 512>}, {pipeline_mode = #tpu.pipeline_mode<synchronous>, transform_indices = @transform_14, window_bounds = array<i64: 1, 512>}, {pipeline_mode = #tpu.pipeline_mode<synchronous>, transform_indices = @transform_15, window_bounds = array<i64: 512, 256>}, {pipeline_mode = #tpu.pipeline_mode<synchronous>, transform_indices = @transform_16, window_bounds = array<i64: 1, 256>}, {pipeline_mode = #tpu.pipeline_mode<synchronous>, transform_indices = @transform_17, window_bounds = array<i64: 1, 256>}, {pipeline_mode = #tpu.pipeline_mode<synchronous>, transform_indices = @transform_18, window_bounds = array<i64: 1, 256>}, {transform_indices = @transform_19, window_bounds = array<i64: 1, 8, 256>}]} {
    %c0 = arith.constant 0 : index
    %c0_0 = arith.constant 0 : index
    %c0_1 = arith.constant 0 : index
    %0 = vector.load %arg2[%c0, %c0_0, %c0_1] : memref<1x16x256xf32, #tpu.memory_space<vmem>>, vector<1x16x256xf32>
    %1 = vector.shape_cast %0 : vector<1x16x256xf32> to vector<16x256xf32>
    %c0_2 = arith.constant 0 : index
    %c0_3 = arith.constant 0 : index
    %c0_4 = arith.constant 0 : index
    %2 = vector.load %arg3[%c0_2, %c0_3, %c0_4] : memref<1x8x256xf32, #tpu.memory_space<vmem>>, vector<1x8x256xf32>
    %3 = vector.shape_cast %2 : vector<1x8x256xf32> to vector<8x256xf32>
    %c0_5 = arith.constant 0 : index
    %c0_6 = arith.constant 0 : index
    %c0_7 = arith.constant 0 : index
    %4 = vector.load %arg4[%c0_5, %c0_6, %c0_7] : memref<1x8x16xi32, #tpu.memory_space<vmem>>, vector<1x8x16xi32>
    %5 = vector.shape_cast %4 : vector<1x8x16xi32> to vector<8x16xi32>
    %6 = arith.truncf %1 : vector<16x256xf32> to vector<16x256xbf16>
    %7 = arith.truncf %3 : vector<8x256xf32> to vector<8x256xbf16>
    %c0_8 = arith.constant 0 : index
    %c0_9 = arith.constant 0 : index
    %8 = vector.load %arg5[%c0_8, %c0_9] : memref<256x256xbf16, #tpu.memory_space<vmem>>, vector<256x256xbf16>
    %cst = arith.constant dense<0.000000e+00> : vector<8x256xf32>
    %9 = tpu.matmul %7, %8, %cst {dimension_numbers = #tpu.dot_dimension_numbers<[1], [0], [0], [1], [0, 0, 1, 1], [], []>} : vector<8x256xbf16>, vector<256x256xbf16>, vector<8x256xf32> -> vector<8x256xf32>
    %c0_10 = arith.constant 0 : index
    %c0_11 = arith.constant 0 : index
    %10 = vector.load %arg6[%c0_10, %c0_11] : memref<1x256xf32, #tpu.memory_space<vmem>>, vector<1x256xf32>
    %11 = vector.broadcast %10 : vector<1x256xf32> to vector<8x256xf32>
    %12 = arith.addf %9, %11 : vector<8x256xf32>
    %c0_12 = arith.constant 0 : index
    %c0_13 = arith.constant 0 : index
    %13 = vector.load %arg7[%c0_12, %c0_13] : memref<256x256xbf16, #tpu.memory_space<vmem>>, vector<256x256xbf16>
    %cst_14 = arith.constant dense<0.000000e+00> : vector<16x256xf32>
    %14 = tpu.matmul %6, %13, %cst_14 {dimension_numbers = #tpu.dot_dimension_numbers<[1], [0], [0], [1], [0, 0, 1, 1], [], []>} : vector<16x256xbf16>, vector<256x256xbf16>, vector<16x256xf32> -> vector<16x256xf32>
    %c0_15 = arith.constant 0 : index
    %c0_16 = arith.constant 0 : index
    %15 = vector.load %arg8[%c0_15, %c0_16] : memref<1x256xf32, #tpu.memory_space<vmem>>, vector<1x256xf32>
    %16 = vector.broadcast %15 : vector<1x256xf32> to vector<16x256xf32>
    %17 = arith.addf %14, %16 : vector<16x256xf32>
    %c0_17 = arith.constant 0 : index
    %c0_18 = arith.constant 0 : index
    %18 = vector.load %arg9[%c0_17, %c0_18] : memref<256x256xbf16, #tpu.memory_space<vmem>>, vector<256x256xbf16>
    %cst_19 = arith.constant dense<0.000000e+00> : vector<16x256xf32>
    %19 = tpu.matmul %6, %18, %cst_19 {dimension_numbers = #tpu.dot_dimension_numbers<[1], [0], [0], [1], [0, 0, 1, 1], [], []>} : vector<16x256xbf16>, vector<256x256xbf16>, vector<16x256xf32> -> vector<16x256xf32>
    %c0_20 = arith.constant 0 : index
    %c0_21 = arith.constant 0 : index
    %20 = vector.load %arg10[%c0_20, %c0_21] : memref<1x256xf32, #tpu.memory_space<vmem>>, vector<1x256xf32>
    %21 = vector.broadcast %20 : vector<1x256xf32> to vector<16x256xf32>
    %22 = arith.addf %19, %21 : vector<16x256xf32>
    %cst_22 = arith.constant 0.0883883461 : f32
    %23 = vector.broadcast %cst_22 : f32 to vector<8x256xf32>
    %24 = arith.mulf %12, %23 : vector<8x256xf32>
    %25 = vector.extract_strided_slice %24 {offsets = [0, 0], sizes = [8, 128], strides = [1, 1]} : vector<8x256xf32> to vector<8x128xf32>
    %26 = vector.extract_strided_slice %24 {offsets = [0, 128], sizes = [8, 128], strides = [1, 1]} : vector<8x256xf32> to vector<8x128xf32>
    %27 = vector.shape_cast %25 : vector<8x128xf32> to vector<1x8x128xf32>
    %28 = vector.shape_cast %26 : vector<8x128xf32> to vector<1x8x128xf32>
    %29 = tpu.concatenate %27, %28 in 0 : vector<1x8x128xf32>, vector<1x8x128xf32> -> vector<2x8x128xf32>
    %30 = arith.truncf %29 : vector<2x8x128xf32> to vector<2x8x128xbf16>
    %31 = vector.extract_strided_slice %17 {offsets = [0, 0], sizes = [16, 128], strides = [1, 1]} : vector<16x256xf32> to vector<16x128xf32>
    %32 = vector.extract_strided_slice %17 {offsets = [0, 128], sizes = [16, 128], strides = [1, 1]} : vector<16x256xf32> to vector<16x128xf32>
    %33 = vector.shape_cast %31 : vector<16x128xf32> to vector<1x16x128xf32>
    %34 = vector.shape_cast %32 : vector<16x128xf32> to vector<1x16x128xf32>
    %35 = tpu.concatenate %33, %34 in 0 : vector<1x16x128xf32>, vector<1x16x128xf32> -> vector<2x16x128xf32>
    %36 = arith.truncf %35 : vector<2x16x128xf32> to vector<2x16x128xbf16>
    %37 = vector.extract_strided_slice %22 {offsets = [0, 0], sizes = [16, 128], strides = [1, 1]} : vector<16x256xf32> to vector<16x128xf32>
    %38 = vector.extract_strided_slice %22 {offsets = [0, 128], sizes = [16, 128], strides = [1, 1]} : vector<16x256xf32> to vector<16x128xf32>
    %39 = vector.shape_cast %37 : vector<16x128xf32> to vector<1x16x128xf32>
    %40 = vector.shape_cast %38 : vector<16x128xf32> to vector<1x16x128xf32>
    %41 = tpu.concatenate %39, %40 in 0 : vector<1x16x128xf32>, vector<1x16x128xf32> -> vector<2x16x128xf32>
    %42 = arith.truncf %41 : vector<2x16x128xf32> to vector<2x16x128xbf16>
    %c0_i32 = arith.constant 0 : i32
    %43 = vector.broadcast %c0_i32 : i32 to vector<8x16xi32>
    %44 = arith.cmpi eq, %5, %43 : vector<8x16xi32>
    %cst_23 = arith.constant -1.000000e+09 : f32
    %cst_24 = arith.constant 0.000000e+00 : f32
    %45 = vector.broadcast %cst_23 : f32 to vector<8x16xf32>
    %46 = vector.broadcast %cst_24 : f32 to vector<8x16xf32>
    %47 = arith.select %44, %45, %46 : vector<8x16xi1>, vector<8x16xf32>
    "tpu.trace_start"() <{level = 10 : i32, message = "hqd,hkd->hqk"}> : () -> ()
    %cst_25 = arith.constant dense<0.000000e+00> : vector<2x8x16xf32>
    %48 = tpu.matmul %30, %36, %cst_25 {dimension_numbers = #tpu.dot_dimension_numbers<[2], [2], [1], [1], [0, 0, 0, 1, 1, 1], [0], [0]>} : vector<2x8x128xbf16>, vector<2x16x128xbf16>, vector<2x8x16xf32> -> vector<2x8x16xf32>
    "tpu.trace_stop"() : () -> ()
    %49 = vector.shape_cast %47 : vector<8x16xf32> to vector<1x8x16xf32>
    %50 = vector.broadcast %49 : vector<1x8x16xf32> to vector<2x8x16xf32>
    %51 = arith.addf %48, %50 : vector<2x8x16xf32>
    %cst_26 = arith.constant dense<0xFF800000> : vector<2x8xf32>
    %52 = vector.multi_reduction <maximumf>, %51, %cst_26 [2] : vector<2x8x16xf32> to vector<2x8xf32>
    %53 = vector.shape_cast %52 : vector<2x8xf32> to vector<2x8x1xf32>
    %54 = vector.broadcast %53 : vector<2x8x1xf32> to vector<2x8x16xf32>
    %55 = arith.subf %51, %54 : vector<2x8x16xf32>
    %56 = math.exp %55 : vector<2x8x16xf32>
    %cst_27 = arith.constant dense<0.000000e+00> : vector<2x8xf32>
    %57 = vector.multi_reduction <add>, %56, %cst_27 [2] : vector<2x8x16xf32> to vector<2x8xf32>
    %58 = vector.shape_cast %57 : vector<2x8xf32> to vector<2x8x1xf32>
    %59 = tpu.reciprocal %58 {approx = true} : vector<2x8x1xf32> -> vector<2x8x1xf32>
    %60 = vector.broadcast %59 : vector<2x8x1xf32> to vector<2x8x16xf32>
    %61 = arith.mulf %56, %60 : vector<2x8x16xf32>
    %62 = arith.truncf %61 : vector<2x8x16xf32> to vector<2x8x16xbf16>
    "tpu.trace_start"() <{level = 10 : i32, message = "hqk,hkd->hqd"}> : () -> ()
    %cst_28 = arith.constant dense<0.000000e+00> : vector<2x8x128xf32>
    %63 = tpu.matmul %62, %42, %cst_28 {dimension_numbers = #tpu.dot_dimension_numbers<[2], [1], [1], [2], [0, 0, 0, 1, 1, 2], [0], [0]>} : vector<2x8x16xbf16>, vector<2x16x128xbf16>, vector<2x8x128xf32> -> vector<2x8x128xf32>
    "tpu.trace_stop"() : () -> ()
    %64 = vector.extract_strided_slice %63 {offsets = [0, 0, 0], sizes = [1, 8, 128], strides = [1, 1, 1]} : vector<2x8x128xf32> to vector<1x8x128xf32>
    %65 = vector.shape_cast %64 : vector<1x8x128xf32> to vector<8x128xf32>
    %66 = vector.extract_strided_slice %63 {offsets = [1, 0, 0], sizes = [1, 8, 128], strides = [1, 1, 1]} : vector<2x8x128xf32> to vector<1x8x128xf32>
    %67 = vector.shape_cast %66 : vector<1x8x128xf32> to vector<8x128xf32>
    %68 = tpu.concatenate %65, %67 in 1 : vector<8x128xf32>, vector<8x128xf32> -> vector<8x256xf32>
    %69 = arith.truncf %68 : vector<8x256xf32> to vector<8x256xbf16>
    %c0_29 = arith.constant 0 : index
    %c0_30 = arith.constant 0 : index
    %70 = vector.load %arg11[%c0_29, %c0_30] : memref<256x256xbf16, #tpu.memory_space<vmem>>, vector<256x256xbf16>
    %cst_31 = arith.constant dense<0.000000e+00> : vector<8x256xf32>
    %71 = tpu.matmul %69, %70, %cst_31 {dimension_numbers = #tpu.dot_dimension_numbers<[1], [0], [0], [1], [0, 0, 1, 1], [], []>} : vector<8x256xbf16>, vector<256x256xbf16>, vector<8x256xf32> -> vector<8x256xf32>
    %c0_32 = arith.constant 0 : index
    %c0_33 = arith.constant 0 : index
    %72 = vector.load %arg12[%c0_32, %c0_33] : memref<1x256xf32, #tpu.memory_space<vmem>>, vector<1x256xf32>
    %73 = vector.broadcast %72 : vector<1x256xf32> to vector<8x256xf32>
    %74 = arith.addf %71, %73 : vector<8x256xf32>
    %75 = arith.addf %3, %74 : vector<8x256xf32>
    %c0_34 = arith.constant 0 : index
    %c0_35 = arith.constant 0 : index
    %76 = vector.load %arg13[%c0_34, %c0_35] : memref<1x256xf32, #tpu.memory_space<vmem>>, vector<1x256xf32>
    %c0_36 = arith.constant 0 : index
    %c0_37 = arith.constant 0 : index
    %77 = vector.load %arg14[%c0_36, %c0_37] : memref<1x256xf32, #tpu.memory_space<vmem>>, vector<1x256xf32>
    %cst_38 = arith.constant dense<0.000000e+00> : vector<8xf32>
    %78 = vector.multi_reduction <add>, %75, %cst_38 [1] : vector<8x256xf32> to vector<8xf32>
    %79 = vector.shape_cast %78 : vector<8xf32> to vector<8x1xf32>
    %cst_39 = arith.constant 2.560000e+02 : f32
    %80 = vector.broadcast %cst_39 : f32 to vector<8x1xf32>
    %81 = arith.divf %79, %80 : vector<8x1xf32>
    %82 = vector.broadcast %81 : vector<8x1xf32> to vector<8x256xf32>
    %83 = arith.subf %75, %82 : vector<8x256xf32>
    %84 = arith.mulf %83, %83 : vector<8x256xf32>
    %cst_40 = arith.constant dense<0.000000e+00> : vector<8xf32>
    %85 = vector.multi_reduction <add>, %84, %cst_40 [1] : vector<8x256xf32> to vector<8xf32>
    %86 = vector.shape_cast %85 : vector<8xf32> to vector<8x1xf32>
    %cst_41 = arith.constant 2.560000e+02 : f32
    %87 = vector.broadcast %cst_41 : f32 to vector<8x1xf32>
    %88 = arith.divf %86, %87 : vector<8x1xf32>
    %89 = vector.broadcast %81 : vector<8x1xf32> to vector<8x256xf32>
    %90 = arith.subf %75, %89 : vector<8x256xf32>
    %cst_42 = arith.constant 9.99999974E-6 : f32
    %91 = vector.broadcast %cst_42 : f32 to vector<8x1xf32>
    %92 = arith.addf %88, %91 : vector<8x1xf32>
    %93 = math.rsqrt %92 : vector<8x1xf32>
    %94 = vector.broadcast %93 : vector<8x1xf32> to vector<8x256xf32>
    %95 = arith.mulf %90, %94 : vector<8x256xf32>
    %96 = vector.broadcast %76 : vector<1x256xf32> to vector<8x256xf32>
    %97 = arith.mulf %95, %96 : vector<8x256xf32>
    %98 = vector.broadcast %77 : vector<1x256xf32> to vector<8x256xf32>
    %99 = arith.addf %97, %98 : vector<8x256xf32>
    %100 = arith.truncf %99 : vector<8x256xf32> to vector<8x256xbf16>
    %c0_43 = arith.constant 0 : index
    %c0_44 = arith.constant 0 : index
    %101 = vector.load %arg15[%c0_43, %c0_44] : memref<256x512xbf16, #tpu.memory_space<vmem>>, vector<256x512xbf16>
    %cst_45 = arith.constant dense<0.000000e+00> : vector<8x512xf32>
    %102 = tpu.matmul %100, %101, %cst_45 {dimension_numbers = #tpu.dot_dimension_numbers<[1], [0], [0], [1], [0, 0, 1, 1], [], []>} : vector<8x256xbf16>, vector<256x512xbf16>, vector<8x512xf32> -> vector<8x512xf32>
    %c0_46 = arith.constant 0 : index
    %c0_47 = arith.constant 0 : index
    %103 = vector.load %arg16[%c0_46, %c0_47] : memref<1x512xf32, #tpu.memory_space<vmem>>, vector<1x512xf32>
    %104 = vector.broadcast %103 : vector<1x512xf32> to vector<8x512xf32>
    %105 = arith.addf %102, %104 : vector<8x512xf32>
    %cst_48 = arith.constant 0.000000e+00 : f32
    %106 = vector.broadcast %cst_48 : f32 to vector<8x512xf32>
    %107 = arith.maximumf %105, %106 : vector<8x512xf32>
    %108 = arith.truncf %107 : vector<8x512xf32> to vector<8x512xbf16>
    %c0_49 = arith.constant 0 : index
    %c0_50 = arith.constant 0 : index
    %109 = vector.load %arg17[%c0_49, %c0_50] : memref<512x256xbf16, #tpu.memory_space<vmem>>, vector<512x256xbf16>
    %cst_51 = arith.constant dense<0.000000e+00> : vector<8x256xf32>
    %110 = tpu.matmul %108, %109, %cst_51 {dimension_numbers = #tpu.dot_dimension_numbers<[1], [0], [0], [1], [0, 0, 1, 1], [], []>} : vector<8x512xbf16>, vector<512x256xbf16>, vector<8x256xf32> -> vector<8x256xf32>
    %c0_52 = arith.constant 0 : index
    %c0_53 = arith.constant 0 : index
    %111 = vector.load %arg18[%c0_52, %c0_53] : memref<1x256xf32, #tpu.memory_space<vmem>>, vector<1x256xf32>
    %112 = vector.broadcast %111 : vector<1x256xf32> to vector<8x256xf32>
    %113 = arith.addf %110, %112 : vector<8x256xf32>
    %114 = arith.addf %99, %113 : vector<8x256xf32>
    %c0_54 = arith.constant 0 : index
    %c0_55 = arith.constant 0 : index
    %115 = vector.load %arg19[%c0_54, %c0_55] : memref<1x256xf32, #tpu.memory_space<vmem>>, vector<1x256xf32>
    %c0_56 = arith.constant 0 : index
    %c0_57 = arith.constant 0 : index
    %116 = vector.load %arg20[%c0_56, %c0_57] : memref<1x256xf32, #tpu.memory_space<vmem>>, vector<1x256xf32>
    %cst_58 = arith.constant dense<0.000000e+00> : vector<8xf32>
    %117 = vector.multi_reduction <add>, %114, %cst_58 [1] : vector<8x256xf32> to vector<8xf32>
    %118 = vector.shape_cast %117 : vector<8xf32> to vector<8x1xf32>
    %cst_59 = arith.constant 2.560000e+02 : f32
    %119 = vector.broadcast %cst_59 : f32 to vector<8x1xf32>
    %120 = arith.divf %118, %119 : vector<8x1xf32>
    %121 = vector.broadcast %120 : vector<8x1xf32> to vector<8x256xf32>
    %122 = arith.subf %114, %121 : vector<8x256xf32>
    %123 = arith.mulf %122, %122 : vector<8x256xf32>
    %cst_60 = arith.constant dense<0.000000e+00> : vector<8xf32>
    %124 = vector.multi_reduction <add>, %123, %cst_60 [1] : vector<8x256xf32> to vector<8xf32>
    %125 = vector.shape_cast %124 : vector<8xf32> to vector<8x1xf32>
    %cst_61 = arith.constant 2.560000e+02 : f32
    %126 = vector.broadcast %cst_61 : f32 to vector<8x1xf32>
    %127 = arith.divf %125, %126 : vector<8x1xf32>
    %128 = vector.broadcast %120 : vector<8x1xf32> to vector<8x256xf32>
    %129 = arith.subf %114, %128 : vector<8x256xf32>
    %cst_62 = arith.constant 9.99999974E-6 : f32
    %130 = vector.broadcast %cst_62 : f32 to vector<8x1xf32>
    %131 = arith.addf %127, %130 : vector<8x1xf32>
    %132 = math.rsqrt %131 : vector<8x1xf32>
    %133 = vector.broadcast %132 : vector<8x1xf32> to vector<8x256xf32>
    %134 = arith.mulf %129, %133 : vector<8x256xf32>
    %135 = vector.broadcast %115 : vector<1x256xf32> to vector<8x256xf32>
    %136 = arith.mulf %134, %135 : vector<8x256xf32>
    %137 = vector.broadcast %116 : vector<1x256xf32> to vector<8x256xf32>
    %138 = arith.addf %136, %137 : vector<8x256xf32>
    %c0_63 = arith.constant 0 : index
    %c0_64 = arith.constant 0 : index
    %c0_65 = arith.constant 0 : index
    %139 = vector.load %arg21[%c0_63, %c0_64, %c0_65] : memref<1x8x256xf32, #tpu.memory_space<vmem>>, vector<1x8x256xf32>
    %140 = vector.shape_cast %139 : vector<1x8x256xf32> to vector<8x256xf32>
    %141 = vector.shape_cast %138 : vector<8x256xf32> to vector<1x8x256xf32>
    tpu.vector_store %arg21[%c0_63, %c0_64, %c0_65], %141 {strides = array<i32>} : memref<1x8x256xf32, #tpu.memory_space<vmem>>, vector<1x8x256xf32>,
    return
  }
  func.func @transform_0(%arg0: i32, %arg1: i32) -> (i32, i32, i32) {
    %c0_i32 = arith.constant 0 : i32
    %c0_i32_0 = arith.constant 0 : i32
    %c0_i32_1 = arith.constant 0 : i32
    return %arg0, %c0_i32, %c0_i32_0 : i32, i32, i32
  }
  func.func @transform_1(%arg0: i32, %arg1: i32) -> (i32, i32, i32) {
    %c0_i32 = arith.constant 0 : i32
    %c0_i32_0 = arith.constant 0 : i32
    return %arg0, %arg1, %c0_i32 : i32, i32, i32
  }
  func.func @transform_2(%arg0: i32, %arg1: i32) -> (i32, i32, i32) {
    %c0_i32 = arith.constant 0 : i32
    %c0_i32_0 = arith.constant 0 : i32
    return %arg0, %arg1, %c0_i32 : i32, i32, i32
  }
  func.func @transform_3(%arg0: i32, %arg1: i32) -> (i32, i32) {
    %c0_i32 = arith.constant 0 : i32
    %c0_i32_0 = arith.constant 0 : i32
    %c0_i32_1 = arith.constant 0 : i32
    return %c0_i32, %c0_i32_0 : i32, i32
  }
  func.func @transform_4(%arg0: i32, %arg1: i32) -> (i32, i32) {
    %c0_i32 = arith.constant 0 : i32
    %c0_i32_0 = arith.constant 0 : i32
    %c0_i32_1 = arith.constant 0 : i32
    return %c0_i32, %c0_i32_0 : i32, i32
  }
  func.func @transform_5(%arg0: i32, %arg1: i32) -> (i32, i32) {
    %c0_i32 = arith.constant 0 : i32
    %c0_i32_0 = arith.constant 0 : i32
    %c0_i32_1 = arith.constant 0 : i32
    return %c0_i32, %c0_i32_0 : i32, i32
  }
  func.func @transform_6(%arg0: i32, %arg1: i32) -> (i32, i32) {
    %c0_i32 = arith.constant 0 : i32
    %c0_i32_0 = arith.constant 0 : i32
    %c0_i32_1 = arith.constant 0 : i32
    return %c0_i32, %c0_i32_0 : i32, i32
  }
  func.func @transform_7(%arg0: i32, %arg1: i32) -> (i32, i32) {
    %c0_i32 = arith.constant 0 : i32
    %c0_i32_0 = arith.constant 0 : i32
    %c0_i32_1 = arith.constant 0 : i32
    return %c0_i32, %c0_i32_0 : i32, i32
  }
  func.func @transform_8(%arg0: i32, %arg1: i32) -> (i32, i32) {
    %c0_i32 = arith.constant 0 : i32
    %c0_i32_0 = arith.constant 0 : i32
    %c0_i32_1 = arith.constant 0 : i32
    return %c0_i32, %c0_i32_0 : i32, i32
  }
  func.func @transform_9(%arg0: i32, %arg1: i32) -> (i32, i32) {
    %c0_i32 = arith.constant 0 : i32
    %c0_i32_0 = arith.constant 0 : i32
    %c0_i32_1 = arith.constant 0 : i32
    return %c0_i32, %c0_i32_0 : i32, i32
  }
  func.func @transform_10(%arg0: i32, %arg1: i32) -> (i32, i32) {
    %c0_i32 = arith.constant 0 : i32
    %c0_i32_0 = arith.constant 0 : i32
    %c0_i32_1 = arith.constant 0 : i32
    return %c0_i32, %c0_i32_0 : i32, i32
  }
  func.func @transform_11(%arg0: i32, %arg1: i32) -> (i32, i32) {
    %c0_i32 = arith.constant 0 : i32
    %c0_i32_0 = arith.constant 0 : i32
    %c0_i32_1 = arith.constant 0 : i32
    return %c0_i32, %c0_i32_0 : i32, i32
  }
  func.func @transform_12(%arg0: i32, %arg1: i32) -> (i32, i32) {
    %c0_i32 = arith.constant 0 : i32
    %c0_i32_0 = arith.constant 0 : i32
    %c0_i32_1 = arith.constant 0 : i32
    return %c0_i32, %c0_i32_0 : i32, i32
  }
  func.func @transform_13(%arg0: i32, %arg1: i32) -> (i32, i32) {
    %c0_i32 = arith.constant 0 : i32
    %c0_i32_0 = arith.constant 0 : i32
    %c0_i32_1 = arith.constant 0 : i32
    return %c0_i32, %c0_i32_0 : i32, i32
  }
  func.func @transform_14(%arg0: i32, %arg1: i32) -> (i32, i32) {
    %c0_i32 = arith.constant 0 : i32
    %c0_i32_0 = arith.constant 0 : i32
    %c0_i32_1 = arith.constant 0 : i32
    return %c0_i32, %c0_i32_0 : i32, i32
  }
  func.func @transform_15(%arg0: i32, %arg1: i32) -> (i32, i32) {
    %c0_i32 = arith.constant 0 : i32
    %c0_i32_0 = arith.constant 0 : i32
    %c0_i32_1 = arith.constant 0 : i32
    return %c0_i32, %c0_i32_0 : i32, i32
  }
  func.func @transform_16(%arg0: i32, %arg1: i32) -> (i32, i32) {
    %c0_i32 = arith.constant 0 : i32
    %c0_i32_0 = arith.constant 0 : i32
    %c0_i32_1 = arith.constant 0 : i32
    return %c0_i32, %c0_i32_0 : i32, i32
  }
  func.func @transform_17(%arg0: i32, %arg1: i32) -> (i32, i32) {
    %c0_i32 = arith.constant 0 : i32
    %c0_i32_0 = arith.constant 0 : i32
    %c0_i32_1 = arith.constant 0 : i32
    return %c0_i32, %c0_i32_0 : i32, i32
  }
  func.func @transform_18(%arg0: i32, %arg1: i32) -> (i32, i32) {
    %c0_i32 = arith.constant 0 : i32
    %c0_i32_0 = arith.constant 0 : i32
    %c0_i32_1 = arith.constant 0 : i32
    return %c0_i32, %c0_i32_0 : i32, i32
  }
  func.func @transform_19(%arg0: i32, %arg1: i32) -> (i32, i32, i32) {
    %c0_i32 = arith.constant 0 : i32
    %c0_i32_0 = arith.constant 0 : i32
    return %arg0, %arg1, %c0_i32 : i32, i32, i32
  }
}

</mosaic_0001>

<bundles_post_ra>
// kernel: tpu_custom_call.1
= control target key start
LH: loop header
LB: loop body
LE: loop exit
PB: predicated region body
PF: predicated region fallthrough
CT: control target
= control target key end

     0   :  { %s5170_s0 = inlined_call_operand.hbm [shape: f32[2,16,256], index: 0, kind: input, shape index: {}]   ;;  %s5171_s1 = inlined_call_operand.hbm [shape: f32[2,16,256], index: 1, kind: input, shape index: {}]   ;;  %s5172_s2 = inlined_call_operand.hbm [shape: s32[2,16,16], index: 2, kind: input, shape index: {}]   ;;  %s5173_s3 = inlined_call_operand.hbm [shape: bf16[256,256], index: 3, kind: input, shape index: {}]   ;;  %s5174_s4 = inlined_call_operand.vmem [shape: f32[1,256], index: 4, kind: input, shape index: {}]   ;;  %s5175_s5 = inlined_call_operand.hbm [shape: bf16[256,256], index: 5, kind: input, shape index: {}]   ;;  %s5176_s6 = inlined_call_operand.vmem [shape: f32[1,256], index: 6, kind: input, shape index: {}]   ;;  %s5177_s7 = inlined_call_operand.hbm [shape: bf16[256,256], index: 7, kind: input, shape index: {}]   ;;  %s5178_s8 = inlined_call_operand.vmem [shape: f32[1,256], index: 8, kind: input, shape index: {}]   ;;  %s5179_s9 = inlined_call_operand.hbm [shape: bf16[256,256], index: 9, kind: input, shape index: {}]   ;;  %s5180_s10 = inlined_call_operand.vmem [shape: f32[1,256], index: 10, kind: input, shape index: {}]   ;;  %s5181_s11 = inlined_call_operand.vmem [shape: f32[1,256], index: 11, kind: input, shape index: {}]   ;;  %s5182_s12 = inlined_call_operand.vmem [shape: f32[1,256], index: 12, kind: input, shape index: {}]   ;;  %s5183_s13 = inlined_call_operand.hbm [shape: bf16[256,512], index: 13, kind: input, shape index: {}]   ;;  %s5184_s14 = inlined_call_operand.vmem [shape: f32[1,512], index: 14, kind: input, shape index: {}]   ;;  %s5185_s15 = inlined_call_operand.hbm [shape: bf16[512,256], index: 15, kind: input, shape index: {}]   ;;  %s5186_s16 = inlined_call_operand.vmem [shape: f32[1,256], index: 16, kind: input, shape index: {}]   ;;  %s5187_s17 = inlined_call_operand.vmem [shape: f32[1,256], index: 17, kind: input, shape index: {}]   ;;  %s5188_s18 = inlined_call_operand.vmem [shape: f32[1,256], index: 18, kind: input, shape index: {}]   ;;  %s5189_s19 = inlined_call_operand.hbm [shape: f32[2,16,256], index: 19, kind: output, shape index: {}]  }
   0x1   :  { %5216 = sst [smem:[#allocation36_spill]] %s5170_s0 }
   0x2   :  { %5217 = sst [smem:[#allocation37_spill]] %s5171_s1 }
   0x3   :  { %5218 = sst [smem:[#allocation38_spill]] %s5172_s2 }
   0x4   :  { %5219 = sst [smem:[#allocation39_spill]] %s5173_s3 }
   0x5   :  { %5220 = sst [smem:[#allocation40_spill]] %s5174_s4 }
   0x6   :  { %5221 = sst [smem:[#allocation41_spill]] %s5176_s6 }
   0x7   :  { %5222 = sst [smem:[#allocation42_spill]] %s5177_s7 }
   0x8   :  { %5223 = sst [smem:[#allocation43_spill]] %s5178_s8 }
   0x9   :  { %5224 = sst [smem:[#allocation44_spill]] %s5180_s10 }
   0xa   :  { %5225 = sst [smem:[#allocation45_spill]] %s5181_s11 }
   0xb   :  { %5226 = sst [smem:[#allocation46_spill]] %s5182_s12 }
   0xc   :  { %5227 = sst [smem:[#allocation47_spill]] %s5183_s13 }
   0xd   :  { %5228 = sst [smem:[#allocation48_spill]] %s5184_s14 }
   0xe   :  { %5229 = sst [smem:[#allocation49_spill]] %s5186_s16 }
   0xf   :  { %5230 = sst [smem:[#allocation50_spill]] %s5187_s17 }
  0x10   :  { %5231 = sst [smem:[#allocation51_spill]] %s5188_s18 }
  0x11   :  { %5232 = sst [smem:[#allocation52_spill]] %s5189_s19 }
  0x12   :  { %24 = vsyncpa [#allocation3], 0 }
  0x13   :  { %26 = vsyncpa [#allocation3 + $0x1], 0 }
  0x14   :  { %27 = vsyncpa [#allocation6], 0 }
  0x15   :  { %29 = vsyncpa [#allocation6 + $0x1], 0 }
  0x16   :  { %30 = vsyncpa [#allocation9], 0 }
  0x17   :  { %31 = vsyncpa [#allocation12], 0 }
  0x18   :  { %32 = vsyncpa [#allocation15], 0 }
  0x19   :  { %33 = vsyncpa [#allocation4], 0 }
  0x1a   :  { %35 = vsyncpa [#allocation4 + $0x1], 0  ;;  %s4675_s0 = smov 0   ;;  %s4677_s30 = smov 0  }
  0x1b   :  { %s4679_s20 = smov 0   ;;  %s4681_s21 = smov 0  }
  0x1c   :  { %s4683_s1 = smov 0   ;;  %s4685_s22 = smov 0  }
  0x1d   :  { %s4687_s2 = smov 0   ;;  %s4689_s23 = smov 0  }
  0x1e   :  { %s4691_s24 = smov 0   ;;  %s4693_s25 = smov 0  }
  0x1f   :  { %s4695_s3 = smov 0  }
  0x20 LB: > { %5233 = sst [smem:[#allocation24_spill]] %s4517_s0  ;;  %s4731_s26 = sadd.s32 4294967295, %s4557_s3   ;;  %s4557_s3 = sphi %s4695_s3, %s41_s3   ;;  %s4553_s25 = sphi %s4693_s25, %s5310_s25   ;;  %s4549_s24 = sphi %s4691_s24, %s5309_s24   ;;  %s4545_s23 = sphi %s4689_s23, %s5308_s23   ;;  %s4541_s2 = sphi %s4687_s2, %s5307_s2   ;;  %s4537_s22 = sphi %s4685_s22, %s5306_s22   ;;  %s4533_s1 = sphi %s4683_s1, %s5305_s1   ;;  %s4529_s21 = sphi %s4681_s21, %s5304_s21   ;;  %s4525_s20 = sphi %s4679_s20, %s5300_s20   ;;  %s4521_s30 = sphi %s4677_s30, %s5299_s30   ;;  %s4517_s0 = sphi %s4675_s0, %s5298_s0  }
  0x21   : > { %5234 = sst [smem:[#allocation25_spill]] %s4521_s30  ;;  %p3280_p0 = scmp.ge.s32.totalorder %s4557_s3, 1 }
  0x22   : > { %5235 = sst [smem:[#allocation26_spill]] %s4525_s20  ;;  %p5209_p1 = scmp.eq.s32.totalorder %s4731_s26, 0 }
  0x23   : > { %5236 = sst [smem:[#allocation27_spill]] %s4541_s2  ;;  %p504_p2 = scmp.lt.s32.totalorder %s4557_s3, 5 }
  0x24   : > { %5237 = sst [smem:[#allocation28_spill]] %s4545_s23  ;;  %s4559_s28 = smov [#allocation8]  }
  0x25   : > { %p4736_p3 = pnand %p3280_p0, %p504_p2  ;;  %s516_s29 = sshll.u32 %s4559_s28, 4  ;;  %s517_s29 = int_to_ptr.vmem [resolvable:$true] %s516_s29 }
  0x26   : > { %s4560_s18 = smov [#allocation11]   ;;  %s4561_s23 = smov [#allocation14]  }
  0x27   : > { %s5238_s27 = scalar_select %p4736_p3, 1, 0 }
  0x28   : > { %p3638_p4 = pneg %p4736_p3  ;;  %s548_s17 = sshll.u32 %s4560_s18, 4  ;;  %s549_s17 = int_to_ptr.vmem [resolvable:$true] %s548_s17 }
  0x29   : > { %s586_s2 = sshll.u32 %s4561_s23, 4  ;;  %s4192_s28 = scalar_lea.vmem %s517_s29, 4096  ;;  %s587_s2 = int_to_ptr.vmem [resolvable:$true] %s586_s2 }
  0x2a   : > { %p4744_p5 = pnand %p3638_p4, %p5209_p1  ;;  %p4193_p7 = scmp.ne.s32.totalorder %s517_s29, %s4192_s28 }
  0x2b   : > { %p4200_p10 = scmp.lt.s32.totalorder %s517_s29, %s517_s29  ;;  %p4201_p11 = scmp.lt.s32.totalorder %s4192_s28, %s4192_s28 }
  0x2c   : > { %s5239_s19 = scalar_select %p4744_p5, 1, 0 }
  0x2d   : > { %p4750_p6 = pneg %p4744_p5  ;;  %p4202_p12 = por %p4201_p11, %p4200_p10 }
  0x2f   : > { %p4195_p8 = pnand %p4193_p7, %p4750_p6 }
  0x31   : > { %p4196_p9 = pneg %p4195_p8 }
  0x33   : > { %p4203_p13 = pnand %p4202_p12, %p4196_p9 }
  0x35   : > { %4206 = shalt.err (!%p4203_p13)
}
  0x36   : > { %s5193_s18 = smov 128   ;;  %s5195_s23 = smov 8  }
  0x37   : > { %s5241_s11 = sld [smem:[#allocation39_spill]]  ;;  %s4218_s10 = scalar_lea.vmem %s549_s17, 4096 }
  0x38   : > { %p4219_p0 = scmp.ne.s32.totalorder %s549_s17, %s4218_s10  ;;  %p4226_p7 = scmp.lt.s32.totalorder %s549_s17, %s549_s17 }
  0x39   : > { %p4227_p8 = scmp.lt.s32.totalorder %s4218_s10, %s4218_s10 }
  0x3a   : > { %p4221_p2 = pnand %p4219_p0, %p4750_p6 }
  0x3b   : > { %p4228_p9 = por %p4227_p8, %p4226_p7 }
  0x3c   : > { %p4222_p4 = pneg %p4221_p2 }
  0x3d   : > { %3641 = dma.hbm_to_vmem [thread:$0]  (!%p4744_p5), %s5241_s11, 4096, %s517_s29, [#allocation9], %s5193_s18, %s5193_s18, %s5195_s23  }
  0x3e   : > { %p4229_p10 = pnand %p4228_p9, %p4222_p4 }
  0x40   : > { %4232 = shalt.err (!%p4229_p10)
}
  0x41   : > { %s5242_s7 = sld [smem:[#allocation42_spill]]  ;;  %s4244_s11 = scalar_lea.vmem %s587_s2, 8192 }
  0x42   : > { %p4245_p11 = scmp.ne.s32.totalorder %s587_s2, %s4244_s11  ;;  %p4252_p0 = scmp.lt.s32.totalorder %s587_s2, %s587_s2 }
  0x43   : > { %p4253_p2 = scmp.lt.s32.totalorder %s4244_s11, %s4244_s11 }
  0x44   : > { %p4247_p12 = pnand %p4245_p11, %p4750_p6 }
  0x45   : > { %p4254_p4 = por %p4253_p2, %p4252_p0 }
  0x46   : > { %p4248_p13 = pneg %p4247_p12 }
  0x47   : > { %3647 = dma.hbm_to_vmem [thread:$0]  (!%p4744_p5), %s5242_s7, 4096, %s549_s17, [#allocation12], %s5193_s18, %s5193_s18, %s5195_s23  }
  0x48   : > { %p4255_p7 = pnand %p4254_p4, %p4248_p13 }
  0x4a   : > { %4258 = shalt.err (!%p4255_p7)
}
  0x4b   : > { %s5191_s10 = smov 256   ;;  %s5192_s8 = smov 16  }
  0x4c   : > { %s5243_s13 = sld [smem:[#allocation47_spill]]  ;;  %s3279_s17 = sadd.s32 4294967294, %s4557_s3  }
  0x4d   : > { %s50_s29 = sadd.s32 1, %s4549_s24  ;;  %s53_s28 = sadd.s32 1, %s4553_s25 }
  0x4e   : > { %p51_p8 = scmp.ge.s32.totalorder %s50_s29, 2  ;;  %s60_s11 = sadd.s32 1, %s4537_s22 }
  0x4f   : > { %p67_p9 = scmp.ne.s32.totalorder %s4537_s22, %s4533_s1  ;;  %p68_p10 = scmp.eq.s32.totalorder %s4557_s3, 0 }
  0x50   : > { %s5312_s29 = smov (%p51_p8, %s50_s29), 0  ;;  %s5314_s28 = smov (!%p51_p8, %s53_s28), %s4553_s25 }
  0x51   : > { %5244 = sst [smem:[#allocation29_spill]] %s5312_s29  ;;  %p4796_p11 = por %p68_p10, %p67_p9 }
  0x52   : > { %3653 = dma.hbm_to_vmem [thread:$0]  (!%p4744_p5), %s5243_s13, 8192, %s587_s2, [#allocation15], %s5191_s10, %s5191_s10, %s5192_s8  }
  0x53   : > { %p73_p12 = scmp.ne.s32.totalorder %s4533_s1, %s4529_s21  ;;  %p55_p13 = scmp.ge.s32.totalorder %s5314_s28, 2 }
  0x54   : > { %s84_s12 = ssub.s32 %s4549_s24, %s5312_s29  ;;  %s88_s10 = sadd.s32 1, %s4525_s20 }
  0x55   : > { %p4806_p0 = por %p5209_p1, %p73_p12  ;;  %s5316_s28 = smov (%p55_p13, %s5314_s28), 0 }
  0x56   : > { %5247 = sst [smem:[#allocation30_spill]] %s5316_s28  ;;  %p95_p2 = scmp.ne.s32.totalorder %s4525_s20, %s4521_s30 }
  0x57   : > { %s5246_s14 = scalar_select %p4806_p0, 1, 0 }
  0x58   : > { %p101_p4 = scmp.ne.s32.totalorder %s4521_s30, %s4517_s0  ;;  %s57_s21 = ssub.s32 %s4553_s25, %s5316_s28 }
  0x59   : > { %p491_p7 = scmp.eq.s32.totalorder %s4731_s26, 3  ;;  %p58_p8 = scmp.eq.s32.totalorder %s57_s21, 0 }
  0x5a   : > { %s85_s8 = sor.u32 %s84_s12, %s57_s21  ;;  %p4822_p12 = por %p95_p2, %p68_p10 }
  0x5b   : > { %p86_p9 = scmp.eq.s32.totalorder %s85_s8, 0  ;;  %p4837_p13 = por %p101_p4, %p5209_p1 }
  0x5c   : > { %s4827_s23 = scalar_select %p58_p8, %s4537_s22, %s60_s11  }
  0x5d   : > { %s4830_s7 = scalar_select %p86_p9, %s4525_s20, %s88_s10  }
  0x5e   : > { %5249 = sst [smem:[#allocation31_spill]] %s4827_s23  ;;  %p4841_p0 = por %p491_p7, %p95_p2 }
  0x5f   : > { %5250 = sst [smem:[#allocation32_spill]] %s4830_s7  ;;  %p497_p10 = scmp.eq.s32.totalorder %s3279_s17, 3 }
  0x60   : > { %s5251_s13 = scalar_select %p4837_p13, 1, 0 }
  0x61   : > { %s5253_s28 = scalar_select %p4841_p0, 1, 0 }
  0x62   : > { %5252 = sst [smem:[#allocation33_spill]] %s5251_s13  ;;  %p3677_p3 = scmp.lt.s32.totalorder %s4557_s3, 4 }
  0x63   : > { %5254 = sst [smem:[#allocation34_spill]] %s5253_s28  ;;  %s646_s8 = sand.u32 1, %s4557_s3  }
  0x64   : > { %s648_s12 = sand.u32 1, %s4525_s20   ;;  %p4851_p8 = por %p497_p10, %p101_p4 }
  0x65   : > { %p4859_p9 = pnand %p3677_p3, %p4796_p11  ;;  %s3291_s21 = sshll.u32 %s648_s12, 4 }
  0x66   : > { %s5255_s10 = scalar_select %p4851_p8, 1, 0 }
  0x67   : > { %s5257_s11 = scalar_select %p4859_p9, 1, 0 }
  0x68   : > { %5256 = sst [smem:[#allocation35_spill]] %s5255_s10  ;;  %s3292_s29 = sshll.u32 %s4549_s24, 1 }
  0x69   : > { %s3293_s23 = sshll.u32 %s4553_s25, 2  ;;  %s650_s28 = scalar_lea.vmem [#allocation5], %s3291_s21 }
  0x6a   : > { %s656_s7 = sadd.s32 %s3293_s23, %s3292_s29  ;;  %s660_s17 = sshll.u32 %s650_s28, 4  ;;  %s661_s17 = int_to_ptr.vmem [resolvable:$true] %s660_s17 }
  0x6b   : > { %s3294_s6 = sshll.u32 %s656_s7, 7  ;;  %s5258_s4 = sld [smem:[#allocation37_spill]] }
  0x6c   : > { %p4872_p2 = pnand %p3677_p3, %p4822_p12  ;;  %s4876_s10 = sshll.u32 %s648_s12, 3 }
  0x6d   : > { %s4566_s30 = smov [#allocation10]   ;;  %s4878_s29 = scalar_lea.sflag [#allocation6], %s646_s8 }
  0x6e   : > { %s532_s23 = sshll.u32 %s4566_s30, 4  ;;  %p5211_p11 = pneg %p4872_p2  ;;  %s533_s23 = int_to_ptr.vmem [resolvable:$true] %s532_s23 }
  0x6f   : > { %s4272_s7 = scalar_lea.vmem %s661_s17, 256 }
  0x70   : > { %p4273_p4 = scmp.ne.s32.totalorder %s661_s17, %s4272_s7 }
  0x71   : > { %s658_s13 = scalar_lea.hbm %s5258_s4, %s3294_s6  ;;  %s4567_s4 = smov [#allocation5]  }
  0x72   : > { %p4275_p7 = pnand %p4273_p4, %p5211_p11  ;;  %s4277_s6 = sshll.u32 %s4567_s4, 4  ;;  %s4278_s6 = int_to_ptr.vmem [resolvable:$false] %s4277_s6 }
  0x73   : > { %s4279_s0 = scalar_lea.vmem %s4278_s6, 512  ;;  %p4280_p3 = scmp.lt.s32.totalorder %s661_s17, %s4278_s6 }
  0x74   : > { %p4276_p10 = pneg %p4275_p7  ;;  %p4281_p12 = scmp.lt.s32.totalorder %s4279_s0, %s4272_s7 }
  0x76   : > { %p4282_p1 = por %p4281_p12, %p4280_p3 }
  0x78   : > { %p4283_p8 = pnand %p4282_p1, %p4276_p10 }
  0x7a   : > { %4286 = shalt.err (!%p4283_p8)
}
  0x7b   : > { %3663 = dma.hbm_to_vmem [thread:$0]  (!%p4872_p2), %s658_s13, 256, %s661_s17, %s4878_s29  }
  0x7c   : > { %s4298_s30 = scalar_lea.vmem %s533_s23, 4096  ;;  %p4306_p11 = scmp.lt.s32.totalorder %s533_s23, %s533_s23 }
  0x7d   : > { %p4299_p0 = scmp.ne.s32.totalorder %s533_s23, %s4298_s30  ;;  %p4307_p13 = scmp.lt.s32.totalorder %s4298_s30, %s4298_s30 }
  0x7f   : > { %p4301_p4 = pnand %p4299_p0, %p4750_p6  ;;  %p4308_p9 = por %p4307_p13, %p4306_p11 }
  0x81   : > { %p4302_p7 = pneg %p4301_p4 }
  0x83   : > { %p4309_p5 = pnand %p4308_p9, %p4302_p7 }
  0x85   : > { %4312 = shalt.err (!%p4309_p5)
}
  0x86   : > { %p5260_p3 = scmp.ne.s32.totalorder %s5239_s19, 0  ;;  %s5261_s20 = smov 8  }
  0x87   : > { %s5262_s18 = smov 128   ;;  %s4568_s13 = smov [#allocation13]  }
  0x88   : > { %3644 = dma.hbm_to_vmem [thread:$0]  (!%p5260_p3), %s5175_s5, 4096, %s533_s23, [#allocation9], %s5262_s18, %s5262_s18, %s5261_s20  }
  0x89   : > { %s564_s12 = sshll.u32 %s4568_s13, 4  ;;  %s4569_s21 = smov [#allocation16]   ;;  %s565_s12 = int_to_ptr.vmem [resolvable:$true] %s564_s12 }
  0x8a   : > { %s602_s17 = sshll.u32 %s4569_s21, 4  ;;  %s4324_s7 = scalar_lea.vmem %s565_s12, 4096  ;;  %s603_s17 = int_to_ptr.vmem [resolvable:$true] %s602_s17 }
  0x8b   : > { %p4325_p1 = scmp.ne.s32.totalorder %s565_s12, %s4324_s7  ;;  %p4332_p13 = scmp.lt.s32.totalorder %s565_s12, %s565_s12 }
  0x8c   : > { %p4333_p8 = scmp.lt.s32.totalorder %s4324_s7, %s4324_s7 }
  0x8d   : > { %p4327_p0 = pnand %p4325_p1, %p4750_p6 }
  0x8e   : > { %p4334_p9 = por %p4333_p8, %p4332_p13 }
  0x8f   : > { %p4328_p5 = pneg %p4327_p0 }
  0x91   : > { %p4335_p11 = pnand %p4334_p9, %p4328_p5 }
  0x93   : > { %4338 = shalt.err (!%p4335_p11)
}
  0x94   : > { %3650 = dma.hbm_to_vmem [thread:$0]  (!%p5260_p3), %s5179_s9, 4096, %s565_s12, [#allocation12], %s5262_s18, %s5262_s18, %s5261_s20  }
  0x95   : > { %s625_s6 = sand.u32 1, %s4537_s22   ;;  %s4350_s0 = scalar_lea.vmem %s603_s17, 8192 }
  0x96   : > { %p4351_p10 = scmp.ne.s32.totalorder %s603_s17, %s4350_s0  ;;  %p4358_p7 = scmp.lt.s32.totalorder %s603_s17, %s603_s17 }
  0x97   : > { %p4359_p1 = scmp.lt.s32.totalorder %s4350_s0, %s4350_s0 }
  0x98   : > { %p4353_p12 = pnand %p4351_p10, %p4750_p6 }
  0x99   : > { %p4360_p0 = por %p4359_p1, %p4358_p7 }
  0x9a   : > { %p4354_p4 = pneg %p4353_p12 }
  0x9c   : > { %p4361_p5 = pnand %p4360_p0, %p4354_p4 }
  0x9e   : > { %4364 = shalt.err (!%p4361_p5)
}
  0x9f   : > { %3656 = dma.hbm_to_vmem [thread:$0]  (!%p5260_p3), %s5185_s15, 8192, %s603_s17, [#allocation15], %s5262_s18, %s5262_s18, %s5261_s20  }
  0xa0   : > { %s3288_s8 = sshll.u32 %s625_s6, 5  ;;  %s3573_s16 = sshll.u32 %s4553_s25, 9 }
  0xa1   : > { %s5263_s21 = sld [smem:[#allocation36_spill]]  ;;  %s629_s23 = scalar_lea.vmem [#allocation2], %s3288_s8 }
  0xa2   : > { %s636_s4 = sshll.u32 %s629_s23, 4  ;;  %s626_s0 = scalar_lea.sflag [#allocation3], %s625_s6  ;;  %s637_s4 = int_to_ptr.vmem [resolvable:$true] %s636_s4 }
  0xa3   : > { %p5264_p6 = scmp.ne.s32.totalorder %s5257_s11, 0  ;;  %s4378_s19 = scalar_lea.vmem %s637_s4, 512 }
  0xa4   : > { %p4379_p8 = scmp.ne.s32.totalorder %s637_s4, %s4378_s19  ;;  %s4570_s30 = smov [#allocation2]  }
  0xa5   : > { %p4367_p13 = pneg %p5264_p6  ;;  %s4383_s28 = sshll.u32 %s4570_s30, 4  ;;  %s4384_s28 = int_to_ptr.vmem [resolvable:$false] %s4383_s28 }
  0xa6   : > { %s4385_s20 = scalar_lea.vmem %s4384_s28, 1024  ;;  %p4386_p3 = scmp.lt.s32.totalorder %s637_s4, %s4384_s28 }
  0xa7   : > { %s635_s7 = scalar_lea.hbm %s5263_s21, %s3573_s16  ;;  %p4381_p9 = pnand %p4379_p8, %p4367_p13 }
  0xa8   : > { %p4387_p10 = scmp.lt.s32.totalorder %s4385_s20, %s4378_s19 }
  0xa9   : > { %p4382_p11 = pneg %p4381_p9 }
  0xaa   : > { %p4388_p12 = por %p4387_p10, %p4386_p3 }
  0xac   : > { %p4389_p4 = pnand %p4388_p12, %p4382_p11 }
  0xae   : > { %4392 = shalt.err (!%p4389_p4)
}
  0xaf   : > { %s5265_s18 = smov 16   ;;  %s5266_s17 = smov 256  }
  0xb0   : > { %3660 = dma.hbm_to_vmem [thread:$0]  (!%p5264_p6), %s635_s7, 512, %s637_s4, %s626_s0, %s5266_s17, %s5266_s17, %s5265_s18  }
  0xb1   : > { %s3296_s6 = sshll.u32 %s4553_s25, 1  ;;  %s671_s8 = scalar_lea.vmem [#allocation7], %s4876_s10 }
  0xb2   : > { %s680_s16 = sshll.u32 %s671_s8, 4  ;;  %s676_s13 = sadd.s32 %s4549_s24, %s3296_s6  ;;  %s681_s16 = int_to_ptr.vmem [resolvable:$true] %s680_s16 }
  0xb3   : > { %s3297_s12 = sshll.u32 %s676_s13, 7  ;;  %s5267_s19 = sld [smem:[#allocation38_spill]] }
  0xb4   : > { %s4406_s28 = scalar_lea.vmem %s681_s16, 128  ;;  %p5268_p1 = pneg %p4872_p2 }
  0xb5   : > { %p4407_p7 = scmp.ne.s32.totalorder %s681_s16, %s4406_s28  ;;  %s4571_s11 = smov [#allocation7]  }
  0xb6   : > { %s4411_s20 = sshll.u32 %s4571_s11, 4  ;;  %s4412_s20 = int_to_ptr.vmem [resolvable:$false] %s4411_s20 }
  0xb7   : > { %p4409_p0 = pnand %p4407_p7, %p5268_p1  ;;  %s4413_s7 = scalar_lea.vmem %s4412_s20, 256 }
  0xb8   : > { %p4414_p6 = scmp.lt.s32.totalorder %s681_s16, %s4412_s20  ;;  %p4415_p13 = scmp.lt.s32.totalorder %s4413_s7, %s4406_s28 }
  0xb9   : > { %s678_s30 = scalar_lea.hbm %s5267_s19, %s3297_s12  ;;  %p4410_p5 = pneg %p4409_p0 }
  0xba   : > { %p4416_p8 = por %p4415_p13, %p4414_p6 }
  0xbc   : > { %p4417_p9 = pnand %p4416_p8, %p4410_p5 }
  0xbe   : > { %4420 = shalt.err (!%p4417_p9)
}
  0xbf   : > { %3666 = dma.hbm_to_vmem [thread:$0]  (!%p4872_p2), %s678_s30, 128, %s681_s16, %s4878_s29  }
  0xc0   : > { %p5269_p11 = scmp.ne.s32.totalorder %s5238_s27, 0 }
  0xc1   : > { %s691_s10 = sand.u32 (!%p5269_p11), 1, %s4533_s1   ;;  %p5270_p3 = scmp.ne.s32.totalorder (!%p5269_p11), %s5246_s14, 0 }
  0xc2   : > { %689 = sbr.rel (%p5269_p11) target bundleno = 2443 (0x98b), region = 96  ;;  %s3299_s4 = sshll.u32 (!%p5269_p11), %s691_s10, 5 }
  0xc3   : > { %s692_s0 = scalar_lea.sflag (!%p5269_p11), [#allocation3], %s691_s10  ;;  %s4945_s18 = scalar_lea.vmem (!%p5269_p11), [#allocation2], %s3299_s4 }
  0xc7   : > { %4492 = dma.done.wait (%p5270_p3), %s692_s0, 512  }
  0xc8   : > { %4494 = vsyncadd (%p5270_p3), %s692_s0, 4294966784  ;;  %s5271_s17 = sld [smem:[#allocation25_spill]]  ;;  %s700_s6 = sand.u32 1, %s4731_s26  }
  0xc9   : > { %s5272_s2 = sld [smem:[#allocation33_spill]]  ;;  %s701_s8 = scalar_lea.sflag [#allocation6], %s700_s6 }
  0xce   : > { %s4953_s29 = sand.u32 1, %s5271_s17  }
  0xcf   : > { %s3300_s27 = sshll.u32 %s4953_s29, 4  ;;  %p5273_p2 = scmp.ne.s32.totalorder %s5272_s2, 0 }
  0xd0   : > { %s4958_s16 = scalar_lea.vmem [#allocation5], %s3300_s27 }
  0xd1   : > { %4496 = dma.done.wait (%p5273_p2), %s701_s8, 384  }
  0xd2   : > { %4498 = vsyncadd (%p5273_p2), %s701_s8, 4294966912  ;;  %s3301_s14 = sshll.u32 %s4953_s29, 3  ;;  %p5274_p10 = scmp.eq.s32.totalorder %s4731_s26, 0 }
  0xd3   : > { %s4965_s13 = scalar_lea.vmem [#allocation7], %s3301_s14 }
  0xd4   : > { %4500 = dma.done.wait (%p5274_p10), [#allocation9], 8192   ;;  %p5275_p12 = pmov %p5274_p10 }
  0xd5   : > { %p5276_p4 = pmov %p5274_p10 }
  0xd6   : > { %4502 = vsyncadd (%p5275_p12), [#allocation9], 4294959104 }
  0xd7   : > { %4504 = dma.done.wait (%p5276_p4), [#allocation12], 8192   ;;  %p5277_p7 = pmov %p5276_p4 }
  0xd8   : > { %p5278_p1 = pmov %p5276_p4 }
  0xd9   : > { %4506 = vsyncadd (%p5277_p7), [#allocation12], 4294959104 }
  0xda   : > { %4508 = dma.done.wait (%p5278_p1), [#allocation15], 16384   ;;  %p5279_p0 = pmov %p5278_p1 }
  0xdb   : > { %v3785_v0 = vld [vmem:[#allocation10 + $0x74] ss:$8 sps:$4 sm:$0xff]   ;;  %v3787_v1 = vld [vmem:[#allocation10 + $0x70] ss:$8 sps:$4 sm:$0xff]   ;;  %v3790_v3 = vld [vmem:[#allocation10 + $0x64] ss:$8 sps:$4 sm:$0xff]  }
  0xdc   : > { %4510 = vsyncadd (%p5279_p0), [#allocation15], 4294950912  ;;  %1263 = vmatprep.subr.bf16.mxu1 %v3785_v0  ;;  %v3788_v2 = vld [vmem:[#allocation8 + $0x74] ss:$8 sps:$4 sm:$0xff]   ;;  %v3792_v4 = vld [vmem:[#allocation8 + $0x70] ss:$8 sps:$4 sm:$0xff]  }
  0xdd   : > { %1264 = vmatpush1.bf16.msra.mxu1 %v3787_v1  ;;  %v3793_v5 = vld [vmem:[#allocation10 + $0x60] ss:$8 sps:$4 sm:$0xff]   ;;  %1018 = vmatprep.subr.bf16.mxu0 %v3788_v2  ;;  %v3794_v6 = vld [vmem:[#allocation8 + $0x64] ss:$8 sps:$4 sm:$0xff]   ;;  %v3796_v7 = vld [vmem:[#allocation10 + $0x54] ss:$8 sps:$4 sm:$0xff]  }
  0xde   : > { %1265 = vmatprep.subr.bf16.mxu1 %v3790_v3  ;;  %1019 = vmatpush1.bf16.msra.mxu0 %v3792_v4  ;;  %v3798_v8 = vld [vmem:[#allocation8 + $0x60] ss:$8 sps:$4 sm:$0xff]   ;;  %v3799_v9 = vld [vmem:[#allocation10 + $0x50] ss:$8 sps:$4 sm:$0xff]   ;;  %v3800_v10 = vld [vmem:[#allocation8 + $0x54] ss:$8 sps:$4 sm:$0xff]  }
  0xdf   : > { %1020 = vmatprep.subr.bf16.mxu0 %v3794_v6  ;;  %v3802_v11 = vld [vmem:[#allocation10 + $0x44] ss:$8 sps:$4 sm:$0xff]   ;;  %v3804_v12 = vld [vmem:[#allocation8 + $0x50] ss:$8 sps:$4 sm:$0xff]   ;;  %v3805_v14 = vld [vmem:[#allocation10 + $0x40] ss:$8 sps:$4 sm:$0xff]  }
  0xe0   : > { %v3806_v13 = vld [vmem:[#allocation8 + $0x44] ss:$8 sps:$4 sm:$0xff]   ;;  %v3808_v15 = vld [vmem:[#allocation10 + $0x34] ss:$8 sps:$4 sm:$0xff]   ;;  %v3810_v16 = vld [vmem:[#allocation8 + $0x40] ss:$8 sps:$4 sm:$0xff]  }
  0xe1   : > { %1266 = vmatpush1.bf16.msra.mxu1 %v3793_v5  ;;  %v3812_v17 = vld [vmem:[#allocation8 + $0x34] ss:$8 sps:$4 sm:$0xff]   ;;  %v3811_v18 = vld [vmem:[#allocation10 + $0x30] ss:$8 sps:$4 sm:$0xff]   ;;  %v3814_v19 = vld [vmem:[#allocation10 + $0x24] ss:$8 sps:$4 sm:$0xff]  }
  0xe2   : > { %1267 = vmatprep.subr.bf16.mxu1 %v3796_v7  ;;  %1021 = vmatpush1.bf16.msra.mxu0 %v3798_v8  ;;  %v3816_v20 = vld [vmem:[#allocation8 + $0x30] ss:$8 sps:$4 sm:$0xff]   ;;  %v3818_v21 = vld [vmem:[#allocation8 + $0x24] ss:$8 sps:$4 sm:$0xff]   ;;  %v3817_v22 = vld [vmem:[#allocation10 + $0x20] ss:$8 sps:$4 sm:$0xff]  }
  0xe3   : > { %1022 = vmatprep.subr.bf16.mxu0 %v3800_v10  ;;  %v3820_v23 = vld [vmem:[#allocation10 + $0x14] ss:$8 sps:$4 sm:$0xff]   ;;  %v3822_v24 = vld [vmem:[#allocation8 + $0x20] ss:$8 sps:$4 sm:$0xff]   ;;  %v3823_v26 = vld [vmem:[#allocation10 + $0x10] ss:$8 sps:$4 sm:$0xff]  }
  0xe4   : > { %v3824_v25 = vld [vmem:[#allocation8 + $0x14] ss:$8 sps:$4 sm:$0xff]   ;;  %v3826_v27 = vld [vmem:[#allocation10 + $0x4] ss:$8 sps:$4 sm:$0xff]   ;;  %v3828_v28 = vld [vmem:[#allocation8 + $0x10] ss:$8 sps:$4 sm:$0xff]  }
  0xe5   : > { %1268 = vmatpush1.bf16.msra.mxu1 %v3799_v9  ;;  %v3830_v29 = vld [vmem:[#allocation8 + $0x4] ss:$8 sps:$4 sm:$0xff]   ;;  %v3829_v30 = vld [vmem:[#allocation10] ss:$8 sps:$4 sm:$0xff]   ;;  %v3832_v31 = vld [vmem:[#allocation10 + $0xf4] ss:$8 sps:$4 sm:$0xff]  }
  0xe6   : > { %1269 = vmatprep.subr.bf16.mxu1 %v3802_v11  ;;  %1023 = vmatpush1.bf16.msra.mxu0 %v3804_v12  ;;  %v3834_v32 = vld [vmem:[#allocation8] ss:$8 sps:$4 sm:$0xff]   ;;  %v3836_v33 = vld [vmem:[#allocation8 + $0xf4] ss:$8 sps:$4 sm:$0xff]   ;;  %v3835_v34 = vld [vmem:[#allocation10 + $0xf0] ss:$8 sps:$4 sm:$0xff]  }
  0xe7   : > { %1024 = vmatprep.subr.bf16.mxu0 %v3806_v13  ;;  %v3838_v35 = vld [vmem:[#allocation10 + $0xe4] ss:$8 sps:$4 sm:$0xff]   ;;  %v3840_v36 = vld [vmem:[#allocation8 + $0xf0] ss:$8 sps:$4 sm:$0xff]   ;;  %v3841_v38 = vld [vmem:[#allocation10 + $0xe0] ss:$8 sps:$4 sm:$0xff]  }
  0xe8   : > { %v3842_v37 = vld [vmem:[#allocation8 + $0xe4] ss:$8 sps:$4 sm:$0xff]   ;;  %v3844_v39 = vld [vmem:[#allocation10 + $0xd4] ss:$8 sps:$4 sm:$0xff]   ;;  %v3846_v40 = vld [vmem:[#allocation8 + $0xe0] ss:$8 sps:$4 sm:$0xff]  }
  0xe9   : > { %1270 = vmatpush1.bf16.msra.mxu1 %v3805_v14  ;;  %v3848_v41 = vld [vmem:[#allocation8 + $0xd4] ss:$8 sps:$4 sm:$0xff]   ;;  %v3847_v42 = vld [vmem:[#allocation10 + $0xd0] ss:$8 sps:$4 sm:$0xff]   ;;  %v3850_v43 = vld [vmem:[#allocation10 + $0xc4] ss:$8 sps:$4 sm:$0xff]  }
  0xea   : > { %1271 = vmatprep.subr.bf16.mxu1 %v3808_v15  ;;  %1025 = vmatpush1.bf16.msra.mxu0 %v3810_v16  ;;  %v3852_v44 = vld [vmem:[#allocation8 + $0xd0] ss:$8 sps:$4 sm:$0xff]   ;;  %v806_v46 = vld [vmem:[%s4945_s18 + $0x18] sm:$0xff]  ;;  %v3856_v50 = vld [vmem:[#allocation10 + $0xb4] ss:$8 sps:$4 sm:$0xff]   ;;  %vm4573_vm0 = vmmov 0  }
  0xeb   : > { %1026 = vmatprep.subr.bf16.mxu0 %v3812_v17  ;;  %v804_v45 = vld [vmem:[%s4945_s18 + $0x8] sm:$0xff]  ;;  %v3854_v47 = vld [vmem:[#allocation8 + $0xc4] ss:$8 sps:$4 sm:$0xff]   ;;  %v3853_v49 = vld [vmem:[#allocation10 + $0xc0] ss:$8 sps:$4 sm:$0xff]   ;;  %s5280_s21 = sld [smem:[#allocation40_spill]] }
  0xec   : > { %v811_v48 = vpack.c.bf16 %v806_v46, %v804_v45  ;;  %v4982_v51 = vld [vmem:[%s4958_s16 + $0x8] sm:$0xff]  ;;  %v803_v4 = vld [vmem:[%s4945_s18] sm:$0xff]  ;;  %v805_v5 = vld [vmem:[%s4945_s18 + $0x10] sm:$0xff]  ;;  %s5281_s30 = sld [smem:[#allocation41_spill]]  ;;  %vm1643_vm2 = vcmask 130048   ;;  %s801_s6 = scalar_lea.vmem [#allocation17], %s3300_s27 }
  0xed   : > { %1272 = vmatpush1.bf16.msra.mxu1 %v3811_v18  ;;  %v3858_v52 = vld [vmem:[#allocation8 + $0xc0] ss:$8 sps:$4 sm:$0xff]   ;;  %v813_v53 = vpack.c.bf16 %v4982_v51, %v4982_v51  ;;  %v3860_v54 = vld [vmem:[#allocation8 + $0xb4] ss:$8 sps:$4 sm:$0xff]   ;;  %v3859_v55 = vld [vmem:[#allocation10 + $0xb0] ss:$8 sps:$4 sm:$0xff]   ;;  %v4991_v8 = vpack.c.bf16 %v805_v5, %v803_v4 }
  0xee   : > { %1273 = vmatprep.subr.bf16.mxu1 %v3814_v19  ;;  %1027 = vmatpush1.bf16.msra.mxu0 %v3816_v20  ;;  %v3862_v56 = vld [vmem:[#allocation10 + $0xa4] ss:$8 sps:$4 sm:$0xff]   ;;  %v3864_v57 = vld [vmem:[#allocation8 + $0xb0] ss:$8 sps:$4 sm:$0xff]   ;;  %v3865_v59 = vld [vmem:[#allocation10 + $0xa0] ss:$8 sps:$4 sm:$0xff]  }
  0xef   : > { %1028 = vmatprep.subr.bf16.mxu0 %v3818_v21  ;;  %1295 = vmatprep.mubr.bf16.mxu1 %v811_v48  ;;  %v3866_v58 = vld [vmem:[#allocation8 + $0xa4] ss:$8 sps:$4 sm:$0xff]   ;;  %v3868_v60 = vld [vmem:[#allocation10 + $0x94] ss:$8 sps:$4 sm:$0xff]   ;;  %v3870_v61 = vld [vmem:[#allocation8 + $0xa0] ss:$8 sps:$4 sm:$0xff]  }
  0xf0   : > { %1050 = vmatprep.mubr.bf16.mxu0 %v813_v53  ;;  %v3872_v62 = vld [vmem:[#allocation8 + $0x94] ss:$8 sps:$4 sm:$0xff]   ;;  %v3871_v63 = vld [vmem:[#allocation10 + $0x90] ss:$8 sps:$4 sm:$0xff]   ;;  %v3874_v0 = vld [vmem:[#allocation10 + $0x84] ss:$8 sps:$4 sm:$0xff]  }
  0xf1   : > { %1274 = vmatpush1.bf16.msra.mxu1 %v3817_v22  ;;  %v3876_v1 = vld [vmem:[#allocation8 + $0x90] ss:$8 sps:$4 sm:$0xff]   ;;  %v3877_v2 = vld [vmem:[#allocation10 + $0x80] ss:$8 sps:$4 sm:$0xff]   ;;  %v3878_v3 = vld [vmem:[#allocation8 + $0x84] ss:$8 sps:$4 sm:$0xff]  }
  0xf2   : > { %1275 = vmatprep.subr.bf16.mxu1 %v3820_v23  ;;  %1029 = vmatpush1.bf16.msra.mxu0 %v3822_v24  ;;  %v3880_v6 = vld [vmem:[#allocation8 + $0x80] ss:$8 sps:$4 sm:$0xff]   ;;  %v3883_v9 = vld [vmem:[#allocation11 + $0x74] ss:$8 sps:$4 sm:$0xff]   ;;  %v3881_v11 = vld [vmem:[#allocation11 + $0x70] ss:$8 sps:$4 sm:$0xff]  }
  0xf3   : > { %1030 = vmatprep.subr.bf16.mxu0 %v3824_v25  ;;  %v4989_v7 = vld [vmem:[%s4958_s16] sm:$0xff]  ;;  %s5282_s20 = sld [smem:[#allocation43_spill]]  ;;  %s3073_s12 = scalar_lea.sflag [#allocation4], %s4953_s29 }
  0xf4   : > { %v812_v10 = vpack.c.bf16 %v4989_v7, %v4989_v7  ;;  %v3886_v12 = vld [vmem:[#allocation11 + $0x64] ss:$8 sps:$4 sm:$0xff]   ;;  %v3884_v13 = vld [vmem:[#allocation11 + $0x60] ss:$8 sps:$4 sm:$0xff]   ;;  %v3889_v14 = vld [vmem:[#allocation11 + $0x54] ss:$8 sps:$4 sm:$0xff]  }
  0xf5   : > { %1276 = vmatpush1.bf16.msra.mxu1 %v3823_v26  ;;  %v3887_v15 = vld [vmem:[#allocation11 + $0x50] ss:$8 sps:$4 sm:$0xff]   ;;  %v3892_v16 = vld [vmem:[#allocation11 + $0x44] ss:$8 sps:$4 sm:$0xff]   ;;  %v3890_v17 = vld [vmem:[#allocation11 + $0x40] ss:$8 sps:$4 sm:$0xff]  }
  0xf6   : > { %1277 = vmatprep.subr.bf16.mxu1 %v3826_v27  ;;  %1031 = vmatpush1.bf16.msra.mxu0 %v3828_v28  ;;  %v3895_v18 = vld [vmem:[#allocation11 + $0x34] ss:$8 sps:$4 sm:$0xff]   ;;  %v3893_v19 = vld [vmem:[#allocation11 + $0x30] ss:$8 sps:$4 sm:$0xff]   ;;  %v3898_v20 = vld [vmem:[#allocation11 + $0x24] ss:$8 sps:$4 sm:$0xff]  }
  0xf7   : > { %1032 = vmatprep.subr.bf16.mxu0 %v3830_v29  ;;  %v3896_v21 = vld [vmem:[#allocation11 + $0x20] ss:$8 sps:$4 sm:$0xff]   ;;  %v3901_v22 = vld [vmem:[#allocation11 + $0x14] ss:$8 sps:$4 sm:$0xff]   ;;  %v3899_v23 = vld [vmem:[#allocation11 + $0x10] ss:$8 sps:$4 sm:$0xff]  }
  0xf8   : > { %v3904_v24 = vld [vmem:[#allocation11 + $0x4] ss:$8 sps:$4 sm:$0xff]   ;;  %v3902_v25 = vld [vmem:[#allocation11] ss:$8 sps:$4 sm:$0xff]   ;;  %v3907_v26 = vld [vmem:[#allocation11 + $0xf4] ss:$8 sps:$4 sm:$0xff]  }
  0xf9   : > { %1278 = vmatpush1.bf16.msra.mxu1 %v3829_v30  ;;  %v3905_v27 = vld [vmem:[#allocation11 + $0xf0] ss:$8 sps:$4 sm:$0xff]   ;;  %v3910_v28 = vld [vmem:[#allocation11 + $0xe4] ss:$8 sps:$4 sm:$0xff]   ;;  %v3908_v29 = vld [vmem:[#allocation11 + $0xe0] ss:$8 sps:$4 sm:$0xff]  }
  0xfa   : > { %1279 = vmatprep.subr.bf16.mxu1 %v3832_v31  ;;  %1033 = vmatpush1.bf16.msra.mxu0 %v3834_v32  ;;  %v3913_v30 = vld [vmem:[#allocation11 + $0xd4] ss:$8 sps:$4 sm:$0xff]   ;;  %v3911_v31 = vld [vmem:[#allocation11 + $0xd0] ss:$8 sps:$4 sm:$0xff]   ;;  %v3916_v32 = vld [vmem:[#allocation11 + $0xc4] ss:$8 sps:$4 sm:$0xff]  }
  0xfb   : > { %1034 = vmatprep.subr.bf16.mxu0 %v3836_v33  ;;  %v3914_v33 = vld [vmem:[#allocation11 + $0xc0] ss:$8 sps:$4 sm:$0xff]   ;;  %v846_v46 = vld [vmem:[%s5280_s21] sm:$0x3]  ;;  %s5283_s4 = sld [smem:[#allocation44_spill]]  ;;  %s4574_s27 = smov [#allocation17]  }
  0xfc   : > { %s5284_s17 = sld [smem:[#allocation45_spill]] }
  0xfd   : > { %1280 = vmatpush2.bf16.msra.mxu1 %v3835_v34  ;;  %v3919_v34 = vld [vmem:[#allocation11 + $0xb4] ss:$8 sps:$4 sm:$0xff]   ;;  %s5285_s8 = sld [smem:[#allocation46_spill]] }
  0xfe   : > { %1281 = vmatprep.subr.bf16.mxu1 %v3838_v35  ;;  %1035 = vmatpush2.bf16.msra.mxu0 %v3840_v36  ;;  %v3917_v35 = vld [vmem:[#allocation11 + $0xb0] ss:$8 sps:$4 sm:$0xff]   ;;  %v3922_v36 = vld [vmem:[#allocation11 + $0xa4] ss:$8 sps:$4 sm:$0xff]   ;;  %s5287_s21 = sld [smem:[#allocation49_spill]] }
  0xff   : > { %1036 = vmatprep.subr.bf16.mxu0 %v3842_v37  ;;  %v3920_v37 = vld [vmem:[#allocation11 + $0xa0] ss:$8 sps:$4 sm:$0xff]   ;;  %s5288_s23 = sld [smem:[#allocation27_spill]] }
 0x100   : > { %s5289_s19 = sld [smem:[#allocation28_spill]] }
 0x101   : > { %1282 = vmatpush2.bf16.msra.mxu1 %v3841_v38  ;;  %v3925_v38 = vld [vmem:[#allocation11 + $0x94] ss:$8 sps:$4 sm:$0xff]   ;;  %s5290_s11 = sld [smem:[#allocation50_spill]] }
 0x102   : > { %1283 = vmatprep.subr.bf16.mxu1 %v3844_v39  ;;  %1037 = vmatpush2.bf16.msra.mxu0 %v3846_v40  ;;  %v3923_v39 = vld [vmem:[#allocation11 + $0x90] ss:$8 sps:$4 sm:$0xff]   ;;  %v3928_v40 = vld [vmem:[#allocation11 + $0x84] ss:$8 sps:$4 sm:$0xff]   ;;  %s5291_s0 = sld [smem:[#allocation51_spill]] }
 0x103   : > { %1038 = vmatprep.subr.bf16.mxu0 %v3848_v41  ;;  %v3926_v41 = vld [vmem:[#allocation11 + $0x80] ss:$8 sps:$4 sm:$0xff]  }
 0x105   : > { %1284 = vmatpush2.bf16.msra.mxu1 %v3847_v42  ;;  %v4572_v42 = vmov 0.0  }
 0x106   : > { %1285 = vmatprep.subr.bf16.mxu1 %v3850_v43  ;;  %1039 = vmatpush2.bf16.msra.mxu0 %v3852_v44  ;;  %v848_v43 = vlaneseq  ;;  %s3569_s7 = sshll.u32 %s5289_s19, 2 }
 0x107   : > { %1040 = vmatprep.subr.bf16.mxu0 %v3854_v47  ;;  %v1091_v47 = vld [vmem:[%s5281_s30] sm:$0x3] }
 0x108   : > { %v5003_v44 = vshrl.u32 %v848_v43, 7 }
 0x109   : > { %1286 = vmatpush2.bf16.msra.mxu1 %v3853_v49 }
 0x10a   : > { %1287 = vmatprep.subr.bf16.mxu1 %v3856_v50  ;;  %1041 = vmatpush2.bf16.msra.mxu0 %v3858_v52  ;;  %v5006_v45 = vsub.s32 0, %v5003_v44 }
 0x10b   : > { %1042 = vmatprep.subr.bf16.mxu0 %v3860_v54 }
 0x10c   : > { %v851_v49 = vrot.slane %v846_v46, %v5006_v45  ;;  %v1096_v50 = vrot.slane %v1091_v47, %v5006_v45 }
 0x10d   : > { %1288 = vmatpush2.bf16.msra.mxu1 %v3859_v55 }
 0x10e   : > { %1289 = vmatprep.subr.bf16.mxu1 %v3862_v56  ;;  %1043 = vmatpush2.bf16.msra.mxu0 %v3864_v57 }
 0x10f   : > { %1044 = vmatprep.subr.bf16.mxu0 %v3866_v58  ;;  %v5017_v58 = vsub.s32 1, %v5003_v44 }
 0x111   : > { %1290 = vmatpush2.bf16.msra.mxu1 %v3865_v59 }
 0x112   : > { %1291 = vmatprep.subr.bf16.mxu1 %v3868_v60  ;;  %1045 = vmatpush2.bf16.msra.mxu0 %v3870_v61 }
 0x113   : > { %1046 = vmatprep.subr.bf16.mxu0 %v3872_v62 }
 0x115   : > { %1292 = vmatpush2.bf16.msra.mxu1 %v3871_v63 }
 0x116   : > { %1293 = vmatprep.subr.bf16.mxu1 %v3874_v0  ;;  %1047 = vmatpush2.bf16.msra.mxu0 %v3876_v1  ;;  %v1100_v1 = vrot.slane %v1091_v47, %v5017_v58 }
 0x117   : > { %1048 = vmatprep.subr.bf16.mxu0 %v3878_v3 }
 0x119   : > { %1294 = vmatpush2.bf16.msra.mxu1 %v3877_v2  ;;  %v855_v2 = vrot.slane %v846_v46, %v5017_v58 }
 0x11a   : > { %1049 = vmatpush2.bf16.msra.mxu0 %v3880_v6  ;;  %3594 = vmatprep.subr.bf16.mxu1 %v4572_v42 }
 0x11b   : > { %1510 = vmatprep.subr.bf16.mxu0 %v3883_v9 }
 0x11c   : > { %1296 = vmatmul.mubr.bf16.vlgmr.msra.gmra.mxu1 %v4991_v8 }
 0x11d   : > { %1051 = vmatmul.mubr.bf16.vlgmr.msra.gmra.mxu0 %v812_v10  ;;  %3596 = vmatprep.mubr.msk.bf16.mxu1 %vm4573_vm0, %v4572_v42 }
 0x11e   : > { %1511 = vmatpush1.bf16.msra.mxu0 %v3881_v11  ;;  %1542 = vmatprep.mubr.bf16.mxu0 %v811_v48  ;;  %v1338_v11 = vld [vmem:[%s5282_s20] sm:$0x3]  ;;  %s3568_s20 = sshll.u32 %s5288_s23, 1  ;;  %s4425_s23 = sshll.u32 %s4574_s27, 4  ;;  %s4426_s23 = int_to_ptr.vmem [resolvable:$false] %s4425_s23 }
 0x11f   : > { %1512 = vmatprep.subr.bf16.mxu0 %v3886_v12  ;;  %v1343_v12 = vrot.slane %v1338_v11, %v5006_v45  ;;  %s3085_s18 = sadd.s32 %s3569_s7, %s3568_s20  ;;  %s4427_s19 = scalar_lea.vmem %s4426_s23, 512 }
 0x120   : > { %s3570_s2 = sshll.u32 %s3085_s18, 7 }
 0x122   : > { %1513 = vmatpush1.bf16.msra.mxu0 %v3884_v13  ;;  %v1347_v13 = vrot.slane %v1338_v11, %v5017_v58  ;;  %v3952_v11 = vld [vmem:[#allocation13 + $0x4] ss:$8 sps:$4 sm:$0xff]  }
 0x123   : > { %1514 = vmatprep.subr.bf16.mxu0 %v3889_v14 }
 0x126   : > { %1515 = vmatpush1.bf16.msra.mxu0 %v3887_v15 }
 0x127   : > { %1516 = vmatprep.subr.bf16.mxu0 %v3892_v16 }
 0x12a   : > { %1517 = vmatpush1.bf16.msra.mxu0 %v3890_v17 }
 0x12b   : > { %1518 = vmatprep.subr.bf16.mxu0 %v3895_v18 }
 0x12e   : > { %1519 = vmatpush1.bf16.msra.mxu0 %v3893_v19 }
 0x12f   : > { %1520 = vmatprep.subr.bf16.mxu0 %v3898_v20 }
 0x132   : > { %1521 = vmatpush1.bf16.msra.mxu0 %v3896_v21 }
 0x133   : > { %1522 = vmatprep.subr.bf16.mxu0 %v3901_v22 }
 0x136   : > { %1523 = vmatpush1.bf16.msra.mxu0 %v3899_v23 }
 0x137   : > { %1524 = vmatprep.subr.bf16.mxu0 %v3904_v24  ;;  %v809_v24 = vld [vmem:[%s4965_s13] sm:$0xff]  ;;  %s5286_s13 = sld [smem:[#allocation48_spill]] }
 0x138   : > { %vm1561_vm1 = vcmp.eq.s32.totalorder %v809_v24, 0  ;;  %v3968_v24 = vld [vmem:[#allocation13 + $0xa0] ss:$8 sps:$4 sm:$0xff]  }
 0x13a   : > { %1525 = vmatpush1.bf16.msra.mxu0 %v3902_v25  ;;  %v1562_v25 = vsel %vm1561_vm1, -1e+09, %v4572_v42 }
 0x13b   : > { %1526 = vmatprep.subr.bf16.mxu0 %v3907_v26 }
 0x13e   : > { %1527 = vmatpush2.bf16.msra.mxu0 %v3905_v27 }
 0x13f   : > { %1528 = vmatprep.subr.bf16.mxu0 %v3910_v28 }
 0x142   : > { %1529 = vmatpush2.bf16.msra.mxu0 %v3908_v29 }
 0x143   : > { %1530 = vmatprep.subr.bf16.mxu0 %v3913_v30 }
 0x146   : > { %1531 = vmatpush2.bf16.msra.mxu0 %v3911_v31 }
 0x147   : > { %1532 = vmatprep.subr.bf16.mxu0 %v3916_v32 }
 0x14a   : > { %1533 = vmatpush2.bf16.msra.mxu0 %v3914_v33 }
 0x14b   : > { %1534 = vmatprep.subr.bf16.mxu0 %v3919_v34 }
 0x14e   : > { %1535 = vmatpush2.bf16.msra.mxu0 %v3917_v35 }
 0x14f   : > { %1536 = vmatprep.subr.bf16.mxu0 %v3922_v36 }
 0x152   : > { %1537 = vmatpush2.bf16.msra.mxu0 %v3920_v37 }
 0x153   : > { %1538 = vmatprep.subr.bf16.mxu0 %v3925_v38 }
 0x156   : > { %1539 = vmatpush2.bf16.msra.mxu0 %v3923_v39 }
 0x157   : > { %1540 = vmatprep.subr.bf16.mxu0 %v3928_v40 }
 0x15a   : > { %1541 = vmatpush2.bf16.msra.mxu0 %v3926_v41 }
 0x15b   : > { %3582 = vmatprep.subr.bf16.mxu0 %v4572_v42 }
 0x15d   : > { %1543 = vmatmul.mubr.bf16.vlgmr.msra.gmra.mxu0 %v4991_v8 }
 0x15e   : > { %3584 = vmatprep.mubr.msk.bf16.mxu0 %vm4573_vm0, %v4572_v42 }
 0x1dc   : > { %v1297_v48 = vpop.f32.mrf.mxu1 }
 0x1dd   : > { %v1052_v53 = vpop.f32.mrf.mxu0  ;;  %v1298_v57 = vadd.f32 %v1297_v48, %v1096_v50 }
 0x1de   : > { %v1299_v52 = vpop.f32.mrf.mxu1  ;;  %v1053_v54 = vadd.f32 %v1052_v53, %v851_v49 }
 0x1df   : > { %v1054_v56 = vpop.f32.mrf.mxu0  ;;  %v1300_v5 = vadd.f32 %v1299_v52, %v1100_v1 }
 0x1e0   : > { %v1301_v55 = vpop.f32.mrf.mxu1  ;;  %v1553_v62 = vmul.f32 0.088388346, %v1053_v54  ;;  %v1055_v6 = vadd.f32 %v1054_v56, %v855_v2  ;;  %v3935_v2 = vld [vmem:[#allocation13 + $0x50] ss:$8 sps:$4 sm:$0xff]  }
 0x1e1   : > { %v1302_v59 = vadd.f32 %v1301_v55, %v1096_v50  ;;  %v1056_v60 = vpop.f32.mrf.mxu0 }
 0x1e2   : > { %v1303_v63 = vpop.f32.mrf.mxu1  ;;  %v1555_v4 = vpack.c.bf16 %v1553_v62, %v1553_v62  ;;  %v1554_v9 = vmul.f32 0.088388346, %v1055_v6  ;;  %v3946_v6 = vld [vmem:[#allocation13 + $0x24] ss:$8 sps:$4 sm:$0xff]  }
 0x1e3   : > { %v1557_v61 = vpack.c.bf16 %v1302_v59, %v1298_v57  ;;  %v1057_v0 = vpop.f32.mrf.mxu0  ;;  %v1304_v3 = vadd.f32 %v1303_v63, %v1100_v1  ;;  %v3931_v57 = vld [vmem:[#allocation13 + $0x74] ss:$8 sps:$4 sm:$0xff]   ;;  %v3934_v63 = vld [vmem:[#allocation13 + $0x64] ss:$8 sps:$4 sm:$0xff]  }
 0x1e4   : > { %v1556_v10 = vpack.c.bf16 %v1554_v9, %v1554_v9  ;;  %v3932_v0 = vld [vmem:[#allocation13 + $0x60] ss:$8 sps:$4 sm:$0xff]   ;;  %v3937_v1 = vld [vmem:[#allocation13 + $0x54] ss:$8 sps:$4 sm:$0xff]  }
 0x1e5   : > { %3583 = vmatpush3.bf16.xpose.msra.mxu0 %v1557_v61  ;;  %v1558_v8 = vpack.c.bf16 %v1304_v3, %v1300_v5  ;;  %v3929_v61 = vld [vmem:[#allocation13 + $0x70] ss:$8 sps:$4 sm:$0xff]   ;;  %v3940_v3 = vld [vmem:[#allocation13 + $0x44] ss:$8 sps:$4 sm:$0xff]   ;;  %v3949_v9 = vld [vmem:[#allocation13 + $0x14] ss:$8 sps:$4 sm:$0xff]  }
 0x1e6   : > { %3588 = vmatprep.subr.bf16.mxu0 %v4572_v42  ;;  %v3941_v5 = vld [vmem:[#allocation13 + $0x30] ss:$8 sps:$4 sm:$0xff]  }
 0x1ec   : > { %3585 = vmatmul.mubr.bf16.vlgmr.msra.gmra.mxu0 %v1555_v4  ;;  %v3938_v4 = vld [vmem:[#allocation13 + $0x40] ss:$8 sps:$4 sm:$0xff]  }
 0x1ed   : > { %3589 = vmatpush3.bf16.xpose.msra.mxu0 %v1558_v8  ;;  %3590 = vmatprep.mubr.msk.bf16.mxu0 %vm4573_vm0, %v4572_v42  ;;  %v3944_v8 = vld [vmem:[#allocation13 + $0x20] ss:$8 sps:$4 sm:$0xff]  }
 0x1f4   : > { %3591 = vmatmul.mubr.bf16.vlgmr.msra.gmra.mxu0 %v1556_v10  ;;  %v3947_v10 = vld [vmem:[#allocation13 + $0x10] ss:$8 sps:$4 sm:$0xff]  }
 0x21d   : > { %v1544_v14 = vpop.f32.mrf.mxu0 }
 0x21e   : > { %v1545_v16 = vadd.f32 %v1544_v14, %v1343_v12  ;;  %v3953_v14 = vld [vmem:[#allocation13 + $0xf0] ss:$8 sps:$4 sm:$0xff]  }
 0x21f   : > { %v1546_v15 = vpop.f32.mrf.mxu0 }
 0x220   : > { %v1547_v17 = vadd.f32 %v1546_v15, %v1347_v13  ;;  %v3958_v15 = vld [vmem:[#allocation13 + $0xe4] ss:$8 sps:$4 sm:$0xff]  }
 0x221   : > { %v1548_v18 = vpop.f32.mrf.mxu0 }
 0x222   : > { %v1549_v19 = vadd.f32 %v1548_v18, %v1343_v12  ;;  %v3950_v12 = vld [vmem:[#allocation13] ss:$8 sps:$4 sm:$0xff]   ;;  %v3959_v18 = vld [vmem:[#allocation13 + $0xd0] ss:$8 sps:$4 sm:$0xff]  }
 0x223   : > { %v1550_v20 = vpop.f32.mrf.mxu0 }
 0x224   : > { %v1559_v21 = vpack.c.bf16 %v1549_v19, %v1545_v16  ;;  %v1551_v22 = vadd.f32 %v1550_v20, %v1347_v13  ;;  %v3955_v13 = vld [vmem:[#allocation13 + $0xf4] ss:$8 sps:$4 sm:$0xff]   ;;  %v3956_v16 = vld [vmem:[#allocation13 + $0xe0] ss:$8 sps:$4 sm:$0xff]   ;;  %v3964_v19 = vld [vmem:[#allocation13 + $0xc4] ss:$8 sps:$4 sm:$0xff]  }
 0x225   : > { %v3962_v20 = vld [vmem:[#allocation13 + $0xc0] ss:$8 sps:$4 sm:$0xff]  }
 0x226   : > { %v1560_v23 = vpack.c.bf16 %v1551_v22, %v1547_v17  ;;  %3595 = vmatpush3.bf16.msra.mxu1 %v1559_v21  ;;  %v3961_v17 = vld [vmem:[#allocation13 + $0xd4] ss:$8 sps:$4 sm:$0xff]   ;;  %v3965_v22 = vld [vmem:[#allocation13 + $0xb0] ss:$8 sps:$4 sm:$0xff]  }
 0x227   : > { %3600 = vmatprep.subr.bf16.mxu1 %v4572_v42  ;;  %v3967_v21 = vld [vmem:[#allocation13 + $0xb4] ss:$8 sps:$4 sm:$0xff]  }
 0x2ac   : > { %v1597_v26 = vpop.f32.mrf.mxu0 }
 0x2ad   : > { %v1598_v27 = vadd.f32 %v1597_v26, %v1562_v25  ;;  %v3971_v26 = vld [vmem:[#allocation13 + $0x90] ss:$8 sps:$4 sm:$0xff]  }
 0x2ae   : > { %v3586_v28 = vpop.f32.mrf.mxu0 }
 0x2af   : > { %v1644_v29 = vsel %vm1643_vm2, %v1598_v27, -inf  ;;  %v3974_v28 = vld [vmem:[#allocation13 + $0x80] ss:$8 sps:$4 sm:$0xff]  }
 0x2b0   : > { %1645 = vmax.xlane.f32.xlu0 %v1644_v29  ;;  %v1600_v30 = vpop.f32.mrf.mxu0 }
 0x2b2   : > { %v3587_v31 = vpop.f32.mrf.mxu0 }
 0x2b4   : > { %v1637_v32 = vpop.f32.mrf.mxu0 }
 0x2b5   : > { %v1638_v33 = vadd.f32 %v1637_v32, %v1562_v25  ;;  %v3973_v25 = vld [vmem:[#allocation13 + $0x94] ss:$8 sps:$4 sm:$0xff]  }
 0x2b6   : > { %v3592_v34 = vpop.f32.mrf.mxu0 }
 0x2b7   : > { %v1647_v35 = vsel %vm1643_vm2, %v1638_v33, -inf }
 0x2b8   : > { %1648 = vmax.xlane.f32.xlu0 %v1647_v35  ;;  %v1640_v36 = vpop.f32.mrf.mxu0 }
 0x2ba   : > { %v3593_v37 = vpop.f32.mrf.mxu0 }
 0x339   : > { %v1646_v38 = vpop.xlane.xlu0 %1645 }
 0x33a   : > { %v1650_v39 = vsub.f32 %v1598_v27, %v1646_v38  ;;  %v3976_v27 = vld [vmem:[#allocation13 + $0x84] ss:$8 sps:$4 sm:$0xff]  }
 0x33c   : > { %v1652_v40 = vmul.f32 1.442695, %v1650_v39  ;;  %v1788_v39 = vld [vmem:[%s5283_s4] sm:$0x3] }
 0x33e   : > { %4169 = vpow2.f32 %v1652_v40  ;;  %v1793_v40 = vrot.slane %v1788_v39, %v5006_v45 }
 0x341   : > { %v1649_v41 = vpop.xlane.xlu0 %1648 }
 0x342   : > { %v1651_v43 = vsub.f32 %v1638_v33, %v1649_v41  ;;  %v1797_v41 = vrot.slane %v1788_v39, %v5017_v58  ;;  %v4037_v39 = vld [vmem:[#allocation14 + $0x1a0] ss:$16 sps:$4 sm:$0xff]  }
 0x344   : > { %v1654_v46 = vmul.f32 1.442695, %v1651_v43 }
 0x346   : > { %4171 = vpow2.f32 %v1654_v46 }
 0x34b   : > { %v4170_v47 = vpop.eup %4169 }
 0x34c   : > { %v1656_v48 = vsel %vm1643_vm2, %v4170_v47, 0.0 }
 0x34d   : > { %1657 = vadd.xlane.f32.xlu1 %v1656_v48 }
 0x353   : > { %v4172_v49 = vpop.eup %4171 }
 0x354   : > { %v1659_v50 = vsel %vm1643_vm2, %v4172_v49, 0.0 }
 0x355   : > { %1660 = vadd.xlane.f32.xlu1 %v1659_v50 }
 0x3d6   : > { %v1658_v52 = vpop.xlane.xlu1 %1657 }
 0x3d7   : > { %4173 = vrcp.f32 %v1658_v52 }
 0x3de   : > { %v1661_v53 = vpop.xlane.xlu1 %1660 }
 0x3df   : > { %4175 = vrcp.f32 %v1661_v53 }
 0x3e4   : > { %v4174_v54 = vpop.eup %4173 }
 0x3e5   : > { %v1664_v55 = vmul.f32 %v4174_v54, %v4170_v47 }
 0x3e7   : > { %v1666_v56 = vpack.c.bf16 %v1664_v55, %v1664_v55  ;;  %v3977_v55 = vld [vmem:[#allocation14 + $0xe0] ss:$16 sps:$4 sm:$0xff]  }
 0x3e9   : > { %3597 = vmatmul.mubr.msk.bf16.vlgmr.msra.gmra.mxu1 %vm1643_vm2, %v1666_v56  ;;  %v3979_v56 = vld [vmem:[#allocation14 + $0xe4] ss:$16 sps:$4 sm:$0xff]  }
 0x3ea   : > { %3601 = vmatpush3.bf16.msra.mxu1 %v1560_v23  ;;  %3602 = vmatprep.mubr.msk.bf16.mxu1 %vm4573_vm0, %v4572_v42  ;;  %v3943_v42 = vld [vmem:[#allocation13 + $0x34] ss:$8 sps:$4 sm:$0xff]   ;;  %v3970_v23 = vld [vmem:[#allocation13 + $0xa4] ss:$8 sps:$4 sm:$0xff]  }
 0x3eb   : > { %1960 = vmatprep.subr.bf16.mxu1 %v3931_v57  ;;  %v3980_v57 = vld [vmem:[#allocation14 + $0xe8] ss:$16 sps:$4 sm:$0xff]   ;;  %2456 = vmatprep.subr.bf16.mxu0 %v3979_v56 }
 0x3ec   : > { %v4176_v59 = vpop.eup %4175  ;;  %2457 = vmatpush1.bf16.msra.mxu0 %v3977_v55  ;;  %v4055_v55 = vld [vmem:[#allocation14 + $0x140] ss:$16 sps:$4 sm:$0xff]   ;;  %v4058_v56 = vld [vmem:[#allocation14 + $0x148] ss:$16 sps:$4 sm:$0xff]  }
 0x3ed   : > { %v1665_v60 = vmul.f32 %v4176_v59, %v4172_v49  ;;  %v3982_v59 = vld [vmem:[#allocation14 + $0xec] ss:$16 sps:$4 sm:$0xff]  }
 0x3ef   : > { %v1667_v62 = vpack.c.bf16 %v1665_v60, %v1665_v60  ;;  %v3985_v60 = vld [vmem:[#allocation14 + $0xc4] ss:$16 sps:$4 sm:$0xff]  }
 0x3f0   : > { %2458 = vmatprep.subr.bf16.mxu0 %v3985_v60  ;;  %v4061_v60 = vld [vmem:[#allocation14 + $0x120] ss:$16 sps:$4 sm:$0xff]  }
 0x3f1   : > { %3603 = vmatmul.mubr.msk.bf16.vlgmr.msra.gmra.mxu1 %vm1643_vm2, %v1667_v62  ;;  %v3983_v62 = vld [vmem:[#allocation14 + $0xc0] ss:$16 sps:$4 sm:$0xff]  }
 0x3f2   : > { %1961 = vmatpush1.bf16.msra.mxu1 %v3929_v61  ;;  %v3988_v61 = vld [vmem:[#allocation14 + $0xcc] ss:$16 sps:$4 sm:$0xff]   ;;  %2459 = vmatpush1.bf16.msra.mxu0 %v3983_v62  ;;  %v4069_v62 = vld [vmem:[#allocation14 + $0x104] ss:$16 sps:$4 sm:$0xff]  }
 0x3f3   : > { %1962 = vmatprep.subr.bf16.mxu1 %v3934_v63  ;;  %v3994_v63 = vld [vmem:[#allocation14 + $0xac] ss:$16 sps:$4 sm:$0xff]  }
 0x3f6   : > { %1963 = vmatpush1.bf16.msra.mxu1 %v3932_v0  ;;  %v3989_v0 = vld [vmem:[#allocation14 + $0xa0] ss:$16 sps:$4 sm:$0xff]  }
 0x3f7   : > { %1964 = vmatprep.subr.bf16.mxu1 %v3937_v1  ;;  %v3992_v1 = vld [vmem:[#allocation14 + $0xa8] ss:$16 sps:$4 sm:$0xff]  }
 0x3fa   : > { %1965 = vmatpush1.bf16.msra.mxu1 %v3935_v2  ;;  %v3997_v2 = vld [vmem:[#allocation14 + $0x84] ss:$16 sps:$4 sm:$0xff]  }
 0x3fb   : > { %1966 = vmatprep.subr.bf16.mxu1 %v3940_v3  ;;  %v4000_v3 = vld [vmem:[#allocation14 + $0x8c] ss:$16 sps:$4 sm:$0xff]  }
 0x3fe   : > { %1967 = vmatpush1.bf16.msra.mxu1 %v3938_v4  ;;  %v3995_v4 = vld [vmem:[#allocation14 + $0x80] ss:$16 sps:$4 sm:$0xff]  }
 0x3ff   : > { %1968 = vmatprep.subr.bf16.mxu1 %v3943_v42  ;;  %v3998_v42 = vld [vmem:[#allocation14 + $0x88] ss:$16 sps:$4 sm:$0xff]  }
 0x402   : > { %1969 = vmatpush1.bf16.msra.mxu1 %v3941_v5  ;;  %v4003_v5 = vld [vmem:[#allocation14 + $0x64] ss:$16 sps:$4 sm:$0xff]  }
 0x403   : > { %1970 = vmatprep.subr.bf16.mxu1 %v3946_v6  ;;  %v4006_v6 = vld [vmem:[#allocation14 + $0x6c] ss:$16 sps:$4 sm:$0xff]  }
 0x406   : > { %1971 = vmatpush1.bf16.msra.mxu1 %v3944_v8  ;;  %v4001_v8 = vld [vmem:[#allocation14 + $0x60] ss:$16 sps:$4 sm:$0xff]  }
 0x407   : > { %1972 = vmatprep.subr.bf16.mxu1 %v3949_v9  ;;  %v4004_v9 = vld [vmem:[#allocation14 + $0x68] ss:$16 sps:$4 sm:$0xff]  }
 0x40a   : > { %1973 = vmatpush1.bf16.msra.mxu1 %v3947_v10  ;;  %v4009_v10 = vld [vmem:[#allocation14 + $0x44] ss:$16 sps:$4 sm:$0xff]  }
 0x40b   : > { %1974 = vmatprep.subr.bf16.mxu1 %v3952_v11  ;;  %v4012_v11 = vld [vmem:[#allocation14 + $0x4c] ss:$16 sps:$4 sm:$0xff]  }
 0x40e   : > { %1975 = vmatpush1.bf16.msra.mxu1 %v3950_v12  ;;  %v4007_v12 = vld [vmem:[#allocation14 + $0x40] ss:$16 sps:$4 sm:$0xff]  }
 0x40f   : > { %1976 = vmatprep.subr.bf16.mxu1 %v3955_v13  ;;  %v4010_v13 = vld [vmem:[#allocation14 + $0x48] ss:$16 sps:$4 sm:$0xff]  }
 0x412   : > { %1977 = vmatpush2.bf16.msra.mxu1 %v3953_v14  ;;  %v4015_v14 = vld [vmem:[#allocation14 + $0x24] ss:$16 sps:$4 sm:$0xff]  }
 0x413   : > { %1978 = vmatprep.subr.bf16.mxu1 %v3958_v15  ;;  %v4018_v15 = vld [vmem:[#allocation14 + $0x2c] ss:$16 sps:$4 sm:$0xff]  }
 0x416   : > { %1979 = vmatpush2.bf16.msra.mxu1 %v3956_v16  ;;  %v4013_v16 = vld [vmem:[#allocation14 + $0x20] ss:$16 sps:$4 sm:$0xff]  }
 0x417   : > { %1980 = vmatprep.subr.bf16.mxu1 %v3961_v17  ;;  %v4016_v17 = vld [vmem:[#allocation14 + $0x28] ss:$16 sps:$4 sm:$0xff]  }
 0x41a   : > { %1981 = vmatpush2.bf16.msra.mxu1 %v3959_v18  ;;  %v4021_v18 = vld [vmem:[#allocation14 + $0x4] ss:$16 sps:$4 sm:$0xff]  }
 0x41b   : > { %1982 = vmatprep.subr.bf16.mxu1 %v3964_v19  ;;  %v4024_v19 = vld [vmem:[#allocation14 + $0xc] ss:$16 sps:$4 sm:$0xff]  }
 0x41e   : > { %1983 = vmatpush2.bf16.msra.mxu1 %v3962_v20  ;;  %v4019_v20 = vld [vmem:[#allocation14] ss:$16 sps:$4 sm:$0xff]  }
 0x41f   : > { %1984 = vmatprep.subr.bf16.mxu1 %v3967_v21  ;;  %v4022_v21 = vld [vmem:[#allocation14 + $0x8] ss:$16 sps:$4 sm:$0xff]  }
 0x422   : > { %1985 = vmatpush2.bf16.msra.mxu1 %v3965_v22  ;;  %v4027_v22 = vld [vmem:[#allocation14 + $0x1e4] ss:$16 sps:$4 sm:$0xff]  }
 0x423   : > { %1986 = vmatprep.subr.bf16.mxu1 %v3970_v23  ;;  %v4030_v23 = vld [vmem:[#allocation14 + $0x1ec] ss:$16 sps:$4 sm:$0xff]  }
 0x426   : > { %1987 = vmatpush2.bf16.msra.mxu1 %v3968_v24  ;;  %v4025_v24 = vld [vmem:[#allocation14 + $0x1e0] ss:$16 sps:$4 sm:$0xff]  }
 0x427   : > { %1988 = vmatprep.subr.bf16.mxu1 %v3973_v25  ;;  %v4028_v25 = vld [vmem:[#allocation14 + $0x1e8] ss:$16 sps:$4 sm:$0xff]  }
 0x42a   : > { %1989 = vmatpush2.bf16.msra.mxu1 %v3971_v26  ;;  %v4033_v26 = vld [vmem:[#allocation14 + $0x1c4] ss:$16 sps:$4 sm:$0xff]  }
 0x42b   : > { %1990 = vmatprep.subr.bf16.mxu1 %v3976_v27  ;;  %v4036_v27 = vld [vmem:[#allocation14 + $0x1cc] ss:$16 sps:$4 sm:$0xff]  }
 0x42e   : > { %1991 = vmatpush2.bf16.msra.mxu1 %v3974_v28  ;;  %v4031_v28 = vld [vmem:[#allocation14 + $0x1c0] ss:$16 sps:$4 sm:$0xff]  }
 0x42f   : > { %2497 = vmatprep.subr.bf16.mxu1 %v3982_v59  ;;  %v4066_v59 = vld [vmem:[#allocation14 + $0x12c] ss:$16 sps:$4 sm:$0xff]  }
 0x4a9   : > { %v1705_v29 = vpop.f32.mrf.mxu1 }
 0x4aa   : > { %v1754_v35 = vpack.c.bf16 %v1705_v29, %v1705_v29  ;;  %v4034_v29 = vld [vmem:[#allocation14 + $0x1c8] ss:$16 sps:$4 sm:$0xff]  }
 0x4ab   : > { %v3598_v30 = vpop.f32.mrf.mxu1 }
 0x4ad   : > { %v1708_v31 = vpop.f32.mrf.mxu1 }
 0x4af   : > { %v3599_v32 = vpop.f32.mrf.mxu1 }
 0x4b1   : > { %v1748_v33 = vpop.f32.mrf.mxu1 }
 0x4b2   : > { %v1755_v34 = vpack.c.bf16 %v1748_v33, %v1748_v33 }
 0x4b3   : > { %v3604_v36 = vpop.f32.mrf.mxu1 }
 0x4b4   : > { %1992 = vmatprep.mubr.bf16.mxu1 %v1755_v34 }
 0x4b5   : > { %v1751_v37 = vpop.f32.mrf.mxu1  ;;  %1993 = vmatmul.mubr.bf16.vlgmr.msra.gmra.mxu1 %v1754_v35 }
 0x4b6   : > { %2498 = vmatpush1.bf16.msra.mxu1 %v3980_v57  ;;  %v4039_v37 = vld [vmem:[#allocation14 + $0x1a4] ss:$16 sps:$4 sm:$0xff]  }
 0x4b7   : > { %v3605_v38 = vpop.f32.mrf.mxu1  ;;  %2499 = vmatprep.subr.bf16.mxu1 %v3988_v61  ;;  %v4063_v57 = vld [vmem:[#allocation14 + $0x124] ss:$16 sps:$4 sm:$0xff]   ;;  %v4064_v61 = vld [vmem:[#allocation14 + $0x128] ss:$16 sps:$4 sm:$0xff]  }
 0x4b8   : > { %v4042_v38 = vld [vmem:[#allocation14 + $0x1ac] ss:$16 sps:$4 sm:$0xff]  }
 0x575   : > { %v1994_v43 = vpop.f32.mrf.mxu1 }
 0x576   : > { %v1995_v46 = vadd.f32 %v1994_v43, %v1793_v40  ;;  %v4040_v40 = vld [vmem:[#allocation14 + $0x1a8] ss:$16 sps:$4 sm:$0xff]   ;;  %v4043_v43 = vld [vmem:[#allocation14 + $0x180] ss:$16 sps:$4 sm:$0xff]  }
 0x577   : > { %v1996_v47 = vpop.f32.mrf.mxu1 }
 0x578   : > { %v1997_v48 = vadd.f32 %v1996_v47, %v1797_v41  ;;  %v5046_v50 = vadd.f32 %v1995_v46, %v4989_v7  ;;  %v3986_v7 = vld [vmem:[#allocation14 + $0xc8] ss:$16 sps:$4 sm:$0xff]   ;;  %v4045_v41 = vld [vmem:[#allocation14 + $0x184] ss:$16 sps:$4 sm:$0xff]   ;;  %v4048_v47 = vld [vmem:[#allocation14 + $0x18c] ss:$16 sps:$4 sm:$0xff]  }
 0x579   : > { %v1998_v49 = vpop.f32.mrf.mxu1  ;;  %2500 = vmatpush1.bf16.msra.mxu1 %v3986_v7  ;;  %v4046_v46 = vld [vmem:[#allocation14 + $0x188] ss:$16 sps:$4 sm:$0xff]   ;;  %v4072_v7 = vld [vmem:[#allocation14 + $0x10c] ss:$16 sps:$4 sm:$0xff]  }
 0x57a   : > { %v5049_v52 = vadd.f32 %v1997_v48, %v4982_v51  ;;  %v3991_v51 = vld [vmem:[#allocation14 + $0xa4] ss:$16 sps:$4 sm:$0xff]   ;;  %2501 = vmatprep.subr.bf16.mxu1 %v3994_v63  ;;  %v4054_v49 = vld [vmem:[#allocation14 + $0x16c] ss:$16 sps:$4 sm:$0xff]   ;;  %v4070_v63 = vld [vmem:[#allocation14 + $0x108] ss:$16 sps:$4 sm:$0xff]  }
 0x57b   : > { %v1999_v53 = vpop.f32.mrf.mxu1  ;;  %2460 = vmatprep.subr.bf16.mxu0 %v3991_v51  ;;  %v4051_v48 = vld [vmem:[#allocation14 + $0x164] ss:$16 sps:$4 sm:$0xff]   ;;  %v4067_v51 = vld [vmem:[#allocation14 + $0x100] ss:$16 sps:$4 sm:$0xff]  }
 0x57c   : > { %v2005_v54 = vadd.f32 %v5049_v52, %v5046_v50  ;;  %2461 = vmatpush1.bf16.msra.mxu0 %v3989_v0  ;;  %v4057_v53 = vld [vmem:[#allocation14 + $0x144] ss:$16 sps:$4 sm:$0xff]  }
 0x57d   : > { %2502 = vmatpush1.bf16.msra.mxu1 %v3992_v1  ;;  %2462 = vmatprep.subr.bf16.mxu0 %v3997_v2  ;;  %v4075_v0 = vld [vmem:[#allocation16 + $0x74] ss:$8 sps:$4 sm:$0xff]  }
 0x57e   : > { %2006 = vadd.xlane.f32.xlu0 %v2005_v54  ;;  %2503 = vmatprep.subr.bf16.mxu1 %v4000_v3  ;;  %v4060_v54 = vld [vmem:[#allocation14 + $0x14c] ss:$16 sps:$4 sm:$0xff]  }
 0x57f   : > { %v4078_v1 = vld [vmem:[#allocation16 + $0x174] ss:$8 sps:$4 sm:$0xff]  }
 0x580   : > { %2463 = vmatpush1.bf16.msra.mxu0 %v3995_v4 }
 0x581   : > { %2504 = vmatpush1.bf16.msra.mxu1 %v3998_v42  ;;  %2464 = vmatprep.subr.bf16.mxu0 %v4003_v5  ;;  %v2003_v42 = vld [vmem:[%s5284_s17] sm:$0x3]  ;;  %s5292_s17 = sld [smem:[#allocation34_spill]] }
 0x582   : > { %2505 = vmatprep.subr.bf16.mxu1 %v4006_v6  ;;  %v2004_v5 = vld [vmem:[%s5285_s8] sm:$0x3]  ;;  %v2026_v6 = vrot.slane %v2003_v42, %v5006_v45  ;;  %s3089_s8 = sshll.u32 %s801_s6, 4  ;;  %s3090_s8 = int_to_ptr.vmem [resolvable:$true] %s3089_s8 }
 0x583   : > { %p4428_p9 = scmp.lt.s32.totalorder %s3090_s8, %s4426_s23 }
 0x584   : > { %2465 = vmatpush1.bf16.msra.mxu0 %v4001_v8  ;;  %v2030_v8 = vrot.slane %v2003_v42, %v5017_v58  ;;  %v4147_v42 = vld [vmem:[#allocation16 + $0xb4] ss:$8 sps:$4 sm:$0xff]  }
 0x585   : > { %2506 = vmatpush1.bf16.msra.mxu1 %v4004_v9  ;;  %2466 = vmatprep.subr.bf16.mxu0 %v4009_v10 }
 0x586   : > { %2507 = vmatprep.subr.bf16.mxu1 %v4012_v11  ;;  %v2039_v11 = vrot.slane %v2004_v5, %v5006_v45 }
 0x587   : > { %p5294_p6 = scmp.ne.s32.totalorder %s5292_s17, 0 }
 0x588   : > { %2467 = vmatpush1.bf16.msra.mxu0 %v4007_v12  ;;  %v2043_v12 = vrot.slane %v2004_v5, %v5017_v58  ;;  %v4150_v5 = vld [vmem:[#allocation16 + $0x1b4] ss:$8 sps:$4 sm:$0xff]  }
 0x589   : > { %2508 = vmatpush1.bf16.msra.mxu1 %v4010_v13  ;;  %2468 = vmatprep.subr.bf16.mxu0 %v4015_v14 }
 0x58a   : > { %2509 = vmatprep.subr.bf16.mxu1 %v4018_v15 }
 0x58c   : > { %2469 = vmatpush1.bf16.msra.mxu0 %v4013_v16 }
 0x58d   : > { %2510 = vmatpush1.bf16.msra.mxu1 %v4016_v17  ;;  %2470 = vmatprep.subr.bf16.mxu0 %v4021_v18 }
 0x58e   : > { %2511 = vmatprep.subr.bf16.mxu1 %v4024_v19 }
 0x590   : > { %2471 = vmatpush1.bf16.msra.mxu0 %v4019_v20  ;;  %v4073_v20 = vld [vmem:[#allocation16 + $0x70] ss:$8 sps:$4 sm:$0xff]  }
 0x591   : > { %2512 = vmatpush1.bf16.msra.mxu1 %v4022_v21  ;;  %2472 = vmatprep.subr.bf16.mxu0 %v4027_v22  ;;  %v4076_v21 = vld [vmem:[#allocation16 + $0x170] ss:$8 sps:$4 sm:$0xff]   ;;  %v4081_v22 = vld [vmem:[#allocation16 + $0x64] ss:$8 sps:$4 sm:$0xff]  }
 0x592   : > { %2513 = vmatprep.subr.bf16.mxu1 %v4030_v23  ;;  %v4084_v23 = vld [vmem:[#allocation16 + $0x164] ss:$8 sps:$4 sm:$0xff]  }
 0x594   : > { %2473 = vmatpush2.bf16.msra.mxu0 %v4025_v24  ;;  %v4079_v24 = vld [vmem:[#allocation16 + $0x60] ss:$8 sps:$4 sm:$0xff]  }
 0x595   : > { %2514 = vmatpush2.bf16.msra.mxu1 %v4028_v25  ;;  %2474 = vmatprep.subr.bf16.mxu0 %v4033_v26  ;;  %v4082_v25 = vld [vmem:[#allocation16 + $0x160] ss:$8 sps:$4 sm:$0xff]   ;;  %v4087_v26 = vld [vmem:[#allocation16 + $0x54] ss:$8 sps:$4 sm:$0xff]  }
 0x596   : > { %2515 = vmatprep.subr.bf16.mxu1 %v4036_v27  ;;  %v4090_v27 = vld [vmem:[#allocation16 + $0x154] ss:$8 sps:$4 sm:$0xff]  }
 0x598   : > { %2475 = vmatpush2.bf16.msra.mxu0 %v4031_v28  ;;  %v4085_v28 = vld [vmem:[#allocation16 + $0x50] ss:$8 sps:$4 sm:$0xff]  }
 0x599   : > { %2516 = vmatpush2.bf16.msra.mxu1 %v4034_v29  ;;  %2476 = vmatprep.subr.bf16.mxu0 %v4039_v37  ;;  %v4088_v29 = vld [vmem:[#allocation16 + $0x150] ss:$8 sps:$4 sm:$0xff]  }
 0x59a   : > { %2517 = vmatprep.subr.bf16.mxu1 %v4042_v38  ;;  %v4100_v37 = vld [vmem:[#allocation16 + $0x130] ss:$8 sps:$4 sm:$0xff]   ;;  %v4105_v38 = vld [vmem:[#allocation16 + $0x24] ss:$8 sps:$4 sm:$0xff]  }
 0x59c   : > { %2477 = vmatpush2.bf16.msra.mxu0 %v4037_v39  ;;  %v4108_v39 = vld [vmem:[#allocation16 + $0x124] ss:$8 sps:$4 sm:$0xff]  }
 0x59d   : > { %2518 = vmatpush2.bf16.msra.mxu1 %v4040_v40  ;;  %2478 = vmatprep.subr.bf16.mxu0 %v4045_v41  ;;  %v4103_v40 = vld [vmem:[#allocation16 + $0x20] ss:$8 sps:$4 sm:$0xff]  }
 0x59e   : > { %2519 = vmatprep.subr.bf16.mxu1 %v4048_v47  ;;  %v4106_v41 = vld [vmem:[#allocation16 + $0x120] ss:$8 sps:$4 sm:$0xff]   ;;  %v4109_v47 = vld [vmem:[#allocation16 + $0x10] ss:$8 sps:$4 sm:$0xff]  }
 0x5a0   : > { %2479 = vmatpush2.bf16.msra.mxu0 %v4043_v43  ;;  %v4111_v43 = vld [vmem:[#allocation16 + $0x14] ss:$8 sps:$4 sm:$0xff]  }
 0x5a1   : > { %2520 = vmatpush2.bf16.msra.mxu1 %v4046_v46  ;;  %2480 = vmatprep.subr.bf16.mxu0 %v4051_v48  ;;  %v4114_v46 = vld [vmem:[#allocation16 + $0x114] ss:$8 sps:$4 sm:$0xff]   ;;  %v4112_v48 = vld [vmem:[#allocation16 + $0x110] ss:$8 sps:$4 sm:$0xff]  }
 0x5a2   : > { %2521 = vmatprep.subr.bf16.mxu1 %v4054_v49  ;;  %v4117_v49 = vld [vmem:[#allocation16 + $0x4] ss:$8 sps:$4 sm:$0xff]  }
 0x607   : > { %v2007_v30 = vpop.xlane.xlu0 %2006 }
 0x608   : > { %v2009_v31 = vmul.f32 0.00390625, %v2007_v30  ;;  %v4093_v30 = vld [vmem:[#allocation16 + $0x44] ss:$8 sps:$4 sm:$0xff]  }
 0x60a   : > { %v5054_v32 = vsub.f32 %v5046_v50, %v2009_v31  ;;  %v5057_v33 = vsub.f32 %v5049_v52, %v2009_v31  ;;  %v4049_v50 = vld [vmem:[#allocation14 + $0x160] ss:$16 sps:$4 sm:$0xff]   ;;  %v4052_v52 = vld [vmem:[#allocation14 + $0x168] ss:$16 sps:$4 sm:$0xff]   ;;  %v4096_v31 = vld [vmem:[#allocation16 + $0x144] ss:$8 sps:$4 sm:$0xff]  }
 0x60b   : > { %2481 = vmatpush2.bf16.msra.mxu0 %v4049_v50  ;;  %2522 = vmatpush2.bf16.msra.mxu1 %v4052_v52  ;;  %v4120_v50 = vld [vmem:[#allocation16 + $0x104] ss:$8 sps:$4 sm:$0xff]   ;;  %v4115_v52 = vld [vmem:[#allocation16] ss:$8 sps:$4 sm:$0xff]  }
 0x60c   : > { %v2012_v34 = vmul.f32 %v5054_v32, %v5054_v32  ;;  %v2013_v35 = vmul.f32 %v5057_v33, %v5057_v33  ;;  %2482 = vmatprep.subr.bf16.mxu0 %v4057_v53  ;;  %2523 = vmatprep.subr.bf16.mxu1 %v4060_v54  ;;  %v4118_v53 = vld [vmem:[#allocation16 + $0x100] ss:$8 sps:$4 sm:$0xff]   ;;  %v4123_v54 = vld [vmem:[#allocation16 + $0xf4] ss:$8 sps:$4 sm:$0xff]  }
 0x60e   : > { %v2014_v36 = vadd.f32 %v2013_v35, %v2012_v34  ;;  %v4099_v34 = vld [vmem:[#allocation16 + $0x34] ss:$8 sps:$4 sm:$0xff]  }
 0x60f   : > { %2483 = vmatpush2.bf16.msra.mxu0 %v4055_v55  ;;  %2524 = vmatpush2.bf16.msra.mxu1 %v4058_v56  ;;  %v4102_v35 = vld [vmem:[#allocation16 + $0x134] ss:$8 sps:$4 sm:$0xff]   ;;  %v4121_v56 = vld [vmem:[#allocation16 + $0xf0] ss:$8 sps:$4 sm:$0xff]  }
 0x610   : > { %2015 = vadd.xlane.f32.xlu1 %v2014_v36  ;;  %2484 = vmatprep.subr.bf16.mxu0 %v4063_v57  ;;  %v4097_v36 = vld [vmem:[#allocation16 + $0x30] ss:$8 sps:$4 sm:$0xff]   ;;  %v4126_v55 = vld [vmem:[#allocation16 + $0x1f4] ss:$8 sps:$4 sm:$0xff]  }
 0x611   : > { %2525 = vmatprep.subr.bf16.mxu1 %v4066_v59  ;;  %v4124_v57 = vld [vmem:[#allocation16 + $0x1f0] ss:$8 sps:$4 sm:$0xff]   ;;  %v4129_v59 = vld [vmem:[#allocation16 + $0xe4] ss:$8 sps:$4 sm:$0xff]  }
 0x613   : > { %2485 = vmatpush2.bf16.msra.mxu0 %v4061_v60  ;;  %2526 = vmatpush2.bf16.msra.mxu1 %v4064_v61  ;;  %v4132_v60 = vld [vmem:[#allocation16 + $0x1e4] ss:$8 sps:$4 sm:$0xff]   ;;  %v4127_v61 = vld [vmem:[#allocation16 + $0xe0] ss:$8 sps:$4 sm:$0xff]  }
 0x614   : > { %2486 = vmatprep.subr.bf16.mxu0 %v4069_v62  ;;  %2527 = vmatprep.subr.bf16.mxu1 %v4072_v7  ;;  %v4130_v62 = vld [vmem:[#allocation16 + $0x1e0] ss:$8 sps:$4 sm:$0xff]   ;;  %v4135_v7 = vld [vmem:[#allocation16 + $0xd4] ss:$8 sps:$4 sm:$0xff]  }
 0x617   : > { %2487 = vmatpush2.bf16.msra.mxu0 %v4067_v51  ;;  %2528 = vmatpush2.bf16.msra.mxu1 %v4070_v63  ;;  %v4138_v51 = vld [vmem:[#allocation16 + $0x1d4] ss:$8 sps:$4 sm:$0xff]   ;;  %v4133_v63 = vld [vmem:[#allocation16 + $0xd0] ss:$8 sps:$4 sm:$0xff]  }
 0x618   : > { %2942 = vmatprep.subr.bf16.mxu0 %v4075_v0  ;;  %2983 = vmatprep.subr.bf16.mxu1 %v4078_v1  ;;  %v4136_v0 = vld [vmem:[#allocation16 + $0x1d0] ss:$8 sps:$4 sm:$0xff]   ;;  %v4141_v1 = vld [vmem:[#allocation16 + $0xc4] ss:$8 sps:$4 sm:$0xff]  }
 0x699   : > { %v2016_v2 = vpop.xlane.xlu1 %2015 }
 0x69a   : > { %v2017_v3 = vmul.f32 0.00390625, %v2016_v2  ;;  %v4144_v2 = vld [vmem:[#allocation16 + $0x1c4] ss:$8 sps:$4 sm:$0xff]  }
 0x69c   : > { %v2018_v4 = vadd.f32 1e-05, %v2017_v3  ;;  %v4139_v3 = vld [vmem:[#allocation16 + $0xc0] ss:$8 sps:$4 sm:$0xff]  }
 0x69e   : > { %4177 = vrsqrt.f32 %v2018_v4  ;;  %v4142_v4 = vld [vmem:[#allocation16 + $0x1c0] ss:$8 sps:$4 sm:$0xff]  }
 0x6ab   : > { %v4178_v9 = vpop.eup %4177 }
 0x6ac   : > { %v2021_v10 = vmul.f32 %v4178_v9, %v5057_v33  ;;  %v2020_v13 = vmul.f32 %v4178_v9, %v5054_v32  ;;  %v4091_v32 = vld [vmem:[#allocation16 + $0x40] ss:$8 sps:$4 sm:$0xff]   ;;  %v4153_v9 = vld [vmem:[#allocation16 + $0xa4] ss:$8 sps:$4 sm:$0xff]  }
 0x6ad   : > { %v4094_v33 = vld [vmem:[#allocation16 + $0x140] ss:$8 sps:$4 sm:$0xff]  }
 0x6ae   : > { %v2034_v14 = vmul.f32 %v2030_v8, %v2021_v10  ;;  %v2033_v15 = vmul.f32 %v2026_v6, %v2020_v13  ;;  %v4145_v6 = vld [vmem:[#allocation16 + $0xb0] ss:$8 sps:$4 sm:$0xff]   ;;  %v4156_v10 = vld [vmem:[#allocation16 + $0x1a4] ss:$8 sps:$4 sm:$0xff]   ;;  %v4159_v13 = vld [vmem:[#allocation16 + $0x94] ss:$8 sps:$4 sm:$0xff]  }
 0x6af   : > { %v4148_v8 = vld [vmem:[#allocation16 + $0x1b0] ss:$8 sps:$4 sm:$0xff]  }
 0x6b0   : > { %v5075_v16 = vadd.f32 %v2043_v12, %v2034_v14  ;;  %v5077_v17 = vadd.f32 %v2039_v11, %v2033_v15  ;;  %v4151_v11 = vld [vmem:[#allocation16 + $0xa0] ss:$8 sps:$4 sm:$0xff]   ;;  %v4162_v14 = vld [vmem:[#allocation16 + $0x194] ss:$8 sps:$4 sm:$0xff]   ;;  %v4157_v15 = vld [vmem:[#allocation16 + $0x90] ss:$8 sps:$4 sm:$0xff]  }
 0x6b1   : > { %v4154_v12 = vld [vmem:[#allocation16 + $0x1a0] ss:$8 sps:$4 sm:$0xff]  }
 0x6b2   : > { %v2049_v18 = vpack.c.bf16 %v5075_v16, %v5075_v16  ;;  %v2048_v19 = vpack.c.bf16 %v5077_v17, %v5077_v17 }
 0x6b4   : > { %2488 = vmatprep.mubr.bf16.mxu0 %v2049_v18  ;;  %2529 = vmatprep.mubr.bf16.mxu1 %v2049_v18  ;;  %v4160_v18 = vld [vmem:[#allocation16 + $0x190] ss:$8 sps:$4 sm:$0xff]  }
 0x6b5   : > { %2489 = vmatmul.mubr.bf16.vlgmr.msra.gmra.mxu0 %v2048_v19  ;;  %2530 = vmatmul.mubr.bf16.vlgmr.msra.gmra.mxu1 %v2048_v19  ;;  %v4165_v19 = vld [vmem:[#allocation16 + $0x84] ss:$8 sps:$4 sm:$0xff]  }
 0x6b6   : > { %2943 = vmatpush1.bf16.msra.mxu0 %v4073_v20  ;;  %2984 = vmatpush1.bf16.msra.mxu1 %v4076_v21  ;;  %v4168_v20 = vld [vmem:[#allocation16 + $0x184] ss:$8 sps:$4 sm:$0xff]   ;;  %v4163_v21 = vld [vmem:[#allocation16 + $0x80] ss:$8 sps:$4 sm:$0xff]  }
 0x6b7   : > { %2944 = vmatprep.subr.bf16.mxu0 %v4081_v22  ;;  %2985 = vmatprep.subr.bf16.mxu1 %v4084_v23  ;;  %v4166_v22 = vld [vmem:[#allocation16 + $0x180] ss:$8 sps:$4 sm:$0xff]   ;;  %v2126_v23 = vsub.s32 2, %v5003_v44 }
 0x6ba   : > { %2945 = vmatpush1.bf16.msra.mxu0 %v4079_v24  ;;  %2986 = vmatpush1.bf16.msra.mxu1 %v4082_v25  ;;  %v2114_v24 = vld [vmem:[%s5286_s13] sm:$0xf]  ;;  %v2130_v25 = vsub.s32 3, %v5003_v44  ;;  %s5293_s13 = sld [smem:[#allocation52_spill]] }
 0x6bb   : > { %2946 = vmatprep.subr.bf16.mxu0 %v4087_v26  ;;  %2987 = vmatprep.subr.bf16.mxu1 %v4090_v27  ;;  %v2119_v26 = vrot.slane %v2114_v24, %v5006_v45  ;;  %v2127_v27 = vrot.slane %v2114_v24, %v2126_v23 }
 0x6be   : > { %2947 = vmatpush1.bf16.msra.mxu0 %v4085_v28  ;;  %2988 = vmatpush1.bf16.msra.mxu1 %v4088_v29  ;;  %v2123_v28 = vrot.slane %v2114_v24, %v5017_v58  ;;  %v2131_v29 = vrot.slane %v2114_v24, %v2130_v25 }
 0x6bf   : > { %2948 = vmatprep.subr.bf16.mxu0 %v4093_v30  ;;  %2989 = vmatprep.subr.bf16.mxu1 %v4096_v31 }
 0x6c0   : > { %s5114_s26 = scalar_lea.hbm %s5293_s13, %s3570_s2 }
 0x6c2   : > { %2949 = vmatpush1.bf16.msra.mxu0 %v4091_v32  ;;  %2990 = vmatpush1.bf16.msra.mxu1 %v4094_v33 }
 0x6c3   : > { %2950 = vmatprep.subr.bf16.mxu0 %v4099_v34  ;;  %2991 = vmatprep.subr.bf16.mxu1 %v4102_v35 }
 0x6c6   : > { %2951 = vmatpush1.bf16.msra.mxu0 %v4097_v36  ;;  %2992 = vmatpush1.bf16.msra.mxu1 %v4100_v37 }
 0x6c7   : > { %2952 = vmatprep.subr.bf16.mxu0 %v4105_v38  ;;  %2993 = vmatprep.subr.bf16.mxu1 %v4108_v39 }
 0x6ca   : > { %2953 = vmatpush1.bf16.msra.mxu0 %v4103_v40  ;;  %2994 = vmatpush1.bf16.msra.mxu1 %v4106_v41 }
 0x6cb   : > { %2954 = vmatprep.subr.bf16.mxu0 %v4111_v43  ;;  %2995 = vmatprep.subr.bf16.mxu1 %v4114_v46 }
 0x6ce   : > { %2955 = vmatpush1.bf16.msra.mxu0 %v4109_v47  ;;  %2996 = vmatpush1.bf16.msra.mxu1 %v4112_v48 }
 0x6cf   : > { %2956 = vmatprep.subr.bf16.mxu0 %v4117_v49  ;;  %2997 = vmatprep.subr.bf16.mxu1 %v4120_v50 }
 0x6d2   : > { %2957 = vmatpush1.bf16.msra.mxu0 %v4115_v52  ;;  %2998 = vmatpush1.bf16.msra.mxu1 %v4118_v53  ;;  %v2610_v53 = vld [vmem:[%s5287_s21] sm:$0x3]  ;;  %s4421_s21 = scalar_lea.vmem %s3090_s8, 256 }
 0x6d3   : > { %2958 = vmatprep.subr.bf16.mxu0 %v4123_v54  ;;  %2999 = vmatprep.subr.bf16.mxu1 %v4126_v55  ;;  %v2615_v54 = vrot.slane %v2610_v53, %v5006_v45  ;;  %v2619_v55 = vrot.slane %v2610_v53, %v5017_v58  ;;  %p4422_p5 = scmp.ne.s32.totalorder %s3090_s8, %s4421_s21  ;;  %p4429_p11 = scmp.lt.s32.totalorder %s4427_s19, %s4421_s21 }
 0x6d5   : > { %p4423_p13 = pnand %p4422_p5, %p5294_p6  ;;  %p4430_p3 = por %p4429_p11, %p4428_p9 }
 0x6d6   : > { %2959 = vmatpush2.bf16.msra.mxu0 %v4121_v56  ;;  %3000 = vmatpush2.bf16.msra.mxu1 %v4124_v57 }
 0x6d7   : > { %2960 = vmatprep.subr.bf16.mxu0 %v4129_v59  ;;  %3001 = vmatprep.subr.bf16.mxu1 %v4132_v60  ;;  %p4424_p8 = pneg %p4423_p13 }
 0x6d9   : > { %p4431_p2 = pnand %p4430_p3, %p4424_p8 }
 0x6da   : > { %2961 = vmatpush2.bf16.msra.mxu0 %v4127_v61  ;;  %3002 = vmatpush2.bf16.msra.mxu1 %v4130_v62 }
 0x6db   : > { %2962 = vmatprep.subr.bf16.mxu0 %v4135_v7  ;;  %3003 = vmatprep.subr.bf16.mxu1 %v4138_v51 }
 0x6de   : > { %2963 = vmatpush2.bf16.msra.mxu0 %v4133_v63  ;;  %3004 = vmatpush2.bf16.msra.mxu1 %v4136_v0 }
 0x6df   : > { %2964 = vmatprep.subr.bf16.mxu0 %v4141_v1  ;;  %3005 = vmatprep.subr.bf16.mxu1 %v4144_v2 }
 0x6e2   : > { %2965 = vmatpush2.bf16.msra.mxu0 %v4139_v3  ;;  %3006 = vmatpush2.bf16.msra.mxu1 %v4142_v4 }
 0x6e3   : > { %2966 = vmatprep.subr.bf16.mxu0 %v4147_v42  ;;  %3007 = vmatprep.subr.bf16.mxu1 %v4150_v5 }
 0x6e6   : > { %2967 = vmatpush2.bf16.msra.mxu0 %v4145_v6  ;;  %3008 = vmatpush2.bf16.msra.mxu1 %v4148_v8 }
 0x6e7   : > { %2968 = vmatprep.subr.bf16.mxu0 %v4153_v9  ;;  %3009 = vmatprep.subr.bf16.mxu1 %v4156_v10 }
 0x6ea   : > { %2969 = vmatpush2.bf16.msra.mxu0 %v4151_v11  ;;  %3010 = vmatpush2.bf16.msra.mxu1 %v4154_v12 }
 0x6eb   : > { %2970 = vmatprep.subr.bf16.mxu0 %v4159_v13  ;;  %3011 = vmatprep.subr.bf16.mxu1 %v4162_v14 }
 0x6ee   : > { %2971 = vmatpush2.bf16.msra.mxu0 %v4157_v15  ;;  %3012 = vmatpush2.bf16.msra.mxu1 %v4160_v18 }
 0x6ef   : > { %2972 = vmatprep.subr.bf16.mxu0 %v4165_v19  ;;  %3013 = vmatprep.subr.bf16.mxu1 %v4168_v20 }
 0x6f2   : > { %2973 = vmatpush2.bf16.msra.mxu0 %v4163_v21  ;;  %3014 = vmatpush2.bf16.msra.mxu1 %v4166_v22 }
 0x775   : > { %v2490_v30 = vpop.f32.mrf.mxu0  ;;  %v2531_v31 = vpop.f32.mrf.mxu1 }
 0x776   : > { %v2491_v32 = vadd.f32 %v2490_v30, %v2119_v26  ;;  %v2532_v33 = vadd.f32 %v2531_v31, %v2127_v27 }
 0x777   : > { %v2492_v34 = vpop.f32.mrf.mxu0  ;;  %v2533_v35 = vpop.f32.mrf.mxu1 }
 0x778   : > { %v2493_v36 = vadd.f32 %v2492_v34, %v2123_v28  ;;  %v2534_v37 = vadd.f32 %v2533_v35, %v2131_v29  ;;  %v2538_v38 = vmax.f32 %v2491_v32, 0.0  ;;  %v2540_v39 = vmax.f32 %v2532_v33, 0.0 }
 0x779   : > { %v2494_v40 = vpop.f32.mrf.mxu0  ;;  %v2535_v41 = vpop.f32.mrf.mxu1 }
 0x77a   : > { %v2539_v43 = vmax.f32 %v2493_v36, 0.0  ;;  %v2541_v44 = vmax.f32 %v2534_v37, 0.0  ;;  %v2542_v50 = vpack.c.bf16 %v2538_v38, %v2538_v38  ;;  %v2544_v52 = vpack.c.bf16 %v2540_v39, %v2540_v39 }
 0x77b   : > { %v2495_v46 = vpop.f32.mrf.mxu0  ;;  %v2536_v47 = vpop.f32.mrf.mxu1 }
 0x77c   : > { %v2543_v48 = vpack.c.bf16 %v2539_v43, %v2539_v43  ;;  %v2545_v49 = vpack.c.bf16 %v2541_v44, %v2541_v44 }
 0x77e   : > { %2974 = vmatprep.mubr.bf16.mxu0 %v2543_v48  ;;  %3015 = vmatprep.mubr.bf16.mxu1 %v2545_v49 }
 0x77f   : > { %2975 = vmatmul.mubr.bf16.vlgmr.msra.gmra.mxu0 %v2542_v50  ;;  %3016 = vmatmul.mubr.bf16.vlgmr.msra.gmra.mxu1 %v2544_v52 }
 0x83f   : > { %v2976_v56 = vpop.f32.mrf.mxu0  ;;  %v3017_v57 = vpop.f32.mrf.mxu1 }
 0x840   : > { %v2977_v59 = vadd.f32 %v2976_v56, %v2615_v54 }
 0x841   : > { %v2978_v60 = vpop.f32.mrf.mxu0  ;;  %v3019_v61 = vpop.f32.mrf.mxu1 }
 0x842   : > { %v3018_v62 = vadd.f32 %v3017_v57, %v2977_v59  ;;  %v2979_v7 = vadd.f32 %v2978_v60, %v2619_v55 }
 0x843   : > { %v2980_v51 = vpop.f32.mrf.mxu0  ;;  %v3021_v63 = vpop.f32.mrf.mxu1 }
 0x844   : > { %v3020_v0 = vadd.f32 %v3019_v61, %v2979_v7  ;;  %v3024_v3 = vadd.f32 %v3018_v62, %v5077_v17  ;;  %v3027_v17 = vld [vmem:[%s5291_s0] sm:$0x3] }
 0x845   : > { %v2981_v1 = vpop.f32.mrf.mxu0  ;;  %v3022_v2 = vpop.f32.mrf.mxu1  ;;  %v3061_v23 = vrot.slane %v3027_v17, %v5006_v45  ;;  %v3065_v24 = vrot.slane %v3027_v17, %v5017_v58 }
 0x846   : > { %v3025_v4 = vadd.f32 %v3020_v0, %v5075_v16  ;;  %v3026_v16 = vld [vmem:[%s5290_s11] sm:$0x3] }
 0x847   : > { %v3048_v18 = vrot.slane %v3026_v16, %v5006_v45  ;;  %v3052_v19 = vrot.slane %v3026_v16, %v5017_v58 }
 0x848   : > { %v3028_v42 = vadd.f32 %v3025_v4, %v3024_v3 }
 0x84a   : > { %3029 = vadd.xlane.f32.xlu0 %v3028_v42 }
 0x8d3   : > { %v3030_v5 = vpop.xlane.xlu0 %3029 }
 0x8d4   : > { %v3031_v6 = vmul.f32 0.00390625, %v3030_v5 }
 0x8d6   : > { %v3032_v8 = vsub.f32 %v3024_v3, %v3031_v6  ;;  %v3033_v9 = vsub.f32 %v3025_v4, %v3031_v6 }
 0x8d8   : > { %v3034_v10 = vmul.f32 %v3032_v8, %v3032_v8  ;;  %v3035_v11 = vmul.f32 %v3033_v9, %v3033_v9 }
 0x8da   : > { %v3036_v12 = vadd.f32 %v3035_v11, %v3034_v10 }
 0x8dc   : > { %3037 = vadd.xlane.f32.xlu1 %v3036_v12 }
 0x965   : > { %v3038_v13 = vpop.xlane.xlu1 %3037 }
 0x966   : > { %v3039_v14 = vmul.f32 0.00390625, %v3038_v13 }
 0x968   : > { %v3040_v15 = vadd.f32 1e-05, %v3039_v14 }
 0x96a   : > { %4179 = vrsqrt.f32 %v3040_v15 }
 0x977   : > { %v4180_v20 = vpop.eup %4179 }
 0x978   : > { %v3042_v21 = vmul.f32 %v4180_v20, %v3032_v8  ;;  %v3043_v22 = vmul.f32 %v4180_v20, %v3033_v9 }
 0x97a   : > { %v3055_v25 = vmul.f32 %v3048_v18, %v3042_v21  ;;  %v3056_v26 = vmul.f32 %v3052_v19, %v3043_v22 }
 0x97c   : > { %v3068_v27 = vadd.f32 %v3061_v23, %v3055_v25  ;;  %v3069_v28 = vadd.f32 %v3065_v24, %v3056_v26 }
 0x97e   : > { %3070 = vst [vmem:[%s801_s6] sm:$0xff] %v3068_v27  ;;  %3071 = vst [vmem:[%s801_s6 + $0x8] sm:$0xff] %v3069_v28 }
 0x97f   : > { %4434 = shalt.err (!%p4431_p2)
}
 0x980   : > { %s4435_s30 = scalar_lea.hbm %s5114_s26, 256  ;;  %s4439_s11 = scalar_lea.hbm %s5293_s13, 1024 }
 0x981   : > { %p4436_p10 = scmp.ne.s32.totalorder %s5114_s26, %s4435_s30  ;;  %p4440_p7 = scmp.lt.s32.totalorder %s5114_s26, %s5293_s13 }
 0x982   : > { %p4441_p1 = scmp.lt.s32.totalorder %s4439_s11, %s4435_s30 }
 0x983   : > { %p4437_p12 = pnand %p4436_p10, %p5294_p6 }
 0x984   : > { %p4442_p0 = por %p4441_p1, %p4440_p7 }
 0x985   : > { %p4438_p4 = pneg %p4437_p12 }
 0x987   : > { %p4443_p5 = pnand %p4442_p0, %p4438_p4 }
 0x989   : > { %4446 = shalt.err (!%p4443_p5)
}
 0x98a   : > { %3636 = dma.vmem_to_hbm [thread:$0]  (%p5294_p6), %s3090_s8, 256, %s5114_s26, %s3073_s12  }
 0x98b PF: > { %s5295_s10 = sld [smem:[#allocation24_spill]]  ;;  %p3684_p13 = scmp.ge.s32.totalorder %s4557_s3, 2 }
 0x98c   : > { %s5296_s4 = sld [smem:[#allocation35_spill]] }
 0x991   : > { %s3101_s0 = sand.u32 1, %s5295_s10  }
 0x992   : > { %p5297_p8 = scmp.ne.s32.totalorder %s5296_s4, 0  ;;  %s3102_s18 = scalar_lea.sflag [#allocation4], %s3101_s0 }
 0x994   : > { %p3668_p9 = pnand %p3684_p13, %p5297_p8 }
 0x996   : > { %p3669_p11 = pneg %p3668_p9 }
 0x998   : > { %4512 = dma.done.wait (%p3669_p11), %s3102_s18, 256  }
 0x999   : > { %4514 = vsyncadd (%p3669_p11), %s3102_s18, 4294967040  ;;  %s41_s3 = sadd.s32 1, %s4557_s3   ;;  %s5298_s0 = sld [smem:[#allocation25_spill]] }
 0x99a   : > { %p38_p3 = scmp.ge.s32.totalorder %s41_s3, 6   ;;  %s5299_s30 = sld [smem:[#allocation26_spill]] }
 0x99b   : > { %s5300_s20 = sld [smem:[#allocation32_spill]]  ;;  %s5304_s21 = smov %s4533_s1 }
 0x99c   : > { %s5301_s17 = sld [smem:[#allocation31_spill]]  ;;  %s5305_s1 = smov %s4537_s22 }
 0x99d   : > { %s5302_s6 = sld [smem:[#allocation29_spill]]  ;;  %s5307_s2 = smov %s4549_s24 }
 0x99e   : > { %s5303_s8 = sld [smem:[#allocation30_spill]]  ;;  %s5308_s23 = smov %s4553_s25 }
 0x9a0   :  { %40 = sbr.rel (!%p38_p3) target bundleno = 32 (0x20), region = 189 }
 0x9a2   : > { %s5306_s22 = smov %s5301_s17 }
 0x9a3   : > { %s5309_s24 = smov %s5302_s6 }
 0x9a4   : > { %s5310_s25 = smov %s5303_s8 }
 0x9a5   :  { %3107 = vsyncpa [#allocation3], 1 }
 0x9a6   :  { %3109 = vsyncpa [#allocation3 + $0x1], 1 }
 0x9a7   :  { %3110 = vsyncpa [#allocation6], 1 }
 0x9a8   :  { %3112 = vsyncpa [#allocation6 + $0x1], 1 }
 0x9a9   :  { %3113 = vsyncpa [#allocation9], 1 }
 0x9aa   :  { %3114 = vsyncpa [#allocation12], 1 }
 0x9ab   :  { %3115 = vsyncpa [#allocation15], 1 }
 0x9ac   :  { %3116 = vsyncpa [#allocation4], 1 }
 0x9ad   :  { %3118 = vsyncpa [#allocation4 + $0x1], 1 }

</bundles_post_ra>
